<compile_context>
chip_gen: v7x
topology: tpu7x:2x2x1
jax: 0.10.0
libtpu: 0.0.40
codegen_flags: <defaults>
</compile_context>

<pallas_src>
import functools
import types

import jax
import jax.numpy as jnp
from jax.experimental import pallas as pl
from jax.experimental.pallas import tpu as pltpu

_BN_EPS = 1e-5


# --------------------------------- kernel -----------------------------------

def _branched_head_kernel(x_ref, w1_ref, b1_ref, w2_ref, b2_ref,
                          w3_ref, b3_ref, o_ref, h1_scr, c_scr, *, mid):
    # x:  (tb, K) bf16
    # w1: (K, 3*mid + csz) bf16, b1: (1, 3*mid + csz) f32
    # w2: (csz, mid) bf16,       b2: (1, mid) f32
    # w3: (3, mid, n_pad) bf16,  b3: (3, 1, n_pad) f32
    # o:  (3, tb, n_pad) f32
    # h1_scr: (tb, 3*mid + csz) f32, c_scr: (tb, mid) f32 (VMEM scratch)

    # Stage 1: gr1 | vd1 | cd1 | center[0] in one wide MXU matmul + ReLU.
    h1_scr[...] = jnp.maximum(
        jnp.dot(x_ref[...], w1_ref[...], preferred_element_type=jnp.float32)
        + b1_ref[...], 0.0)

    # Stage 2: center[1] on the center[0] slice (aligned 128-lane boundary).
    c0 = h1_scr[:, 3 * mid:].astype(jnp.bfloat16)
    c_scr[...] = jnp.maximum(
        jnp.dot(c0, w2_ref[...], preferred_element_type=jnp.float32)
        + b2_ref[...], 0.0)

    # Stage 3: residual adds fused with the three fc projections.
    c = c_scr[...]
    for br in range(3):                                   # static 3-way unroll
        a = (h1_scr[:, br * mid:(br + 1) * mid] + c).astype(jnp.bfloat16)
        y = jnp.dot(a, w3_ref[br], preferred_element_type=jnp.float32) + b3_ref[br]
        o_ref[br] = y.astype(o_ref.dtype)


# ----------------------- deterministic parameter init -----------------------

def init_linear(key, in_f, out_f):
    k1, k2 = jax.random.split(key)
    bound = 1.0 / (in_f ** 0.5)
    w = jax.random.uniform(k1, (out_f, in_f), jnp.float32, -bound, bound)
    b = jax.random.uniform(k2, (out_f,), jnp.float32, -bound, bound)
    return w, b


def init_head(key, in_f, out_f):
    k1, k2, k3 = jax.random.split(key, 3)
    w, b = init_linear(k1, in_f, out_f)
    gamma = 1.0 + 0.1 * jax.random.normal(k2, (out_f,), jnp.float32)
    beta = 0.1 * jax.random.normal(k3, (out_f,), jnp.float32)
    mean = jnp.zeros((out_f,), jnp.float32)   # BatchNorm1d running_mean init
    var = jnp.ones((out_f,), jnp.float32)     # BatchNorm1d running_var init
    return dict(w=w, b=b, gamma=gamma, beta=beta, mean=mean, var=var)


def init_branched_head(key, conf, input_size, middle_size=512):
    ks = jax.random.split(key, 8)
    return dict(
        gr1=init_head(ks[0], input_size, middle_size),
        vd1=init_head(ks[1], input_size, middle_size),
        cd1=init_head(ks[2], input_size, middle_size),
        center0=init_head(ks[3], input_size, 1280),
        center1=init_head(ks[4], 1280, middle_size),
        fc_gr=init_linear(ks[5], middle_size, conf.gr_size),
        fc_vd=init_linear(ks[6], middle_size, conf.vd_size),
        fc_cd=init_linear(ks[7], middle_size, conf.cd_size),
    )


# -------------------- one-time parameter preparation -------------------------

def _fold_head(h):
    """Fold eval-mode BatchNorm1d into the Linear; return ((in,out) W, bias)."""
    scale = h["gamma"] / jnp.sqrt(h["var"] + _BN_EPS)
    w_t = (h["w"] * scale[:, None]).T                       # (in, out)
    b = h["b"] * scale + h["beta"] - h["mean"] * scale
    return w_t, b


def prepare_params(raw, conf, middle_size=512, center_size=1280):
    n = conf.gr_size
    # mirrors `np.array([gr, vd, cd])` which requires equal branch widths
    assert conf.vd_size == n and conf.cd_size == n

    # Stage 1: gr1 | vd1 | cd1 | center0 concatenated along the output axis.
    folded = [_fold_head(raw[k]) for k in ("gr1", "vd1", "cd1", "center0")]
    w1 = jnp.concatenate([w for w, _ in folded], axis=1).astype(jnp.bfloat16)
    b1 = jnp.concatenate([b for _, b in folded])[None, :].astype(jnp.float32)

    # Stage 2: center1.
    w2_t, b2v = _fold_head(raw["center1"])
    w2 = w2_t.astype(jnp.bfloat16)
    b2 = b2v[None, :].astype(jnp.float32)

    # Stage 3: fc_gr / fc_vd / fc_cd, output padded to a 128-lane multiple.
    n_pad = max(128, -(-n // 128) * 128)

    def pad_fc(w, b):
        wp = jnp.zeros((middle_size, n_pad), jnp.float32).at[:, :n].set(w.T)
        bp = jnp.zeros((1, n_pad), jnp.float32).at[:, :n].set(b)
        return wp, bp

    fcs = [pad_fc(*raw[k]) for k in ("fc_gr", "fc_vd", "fc_cd")]
    w3 = jnp.stack([w for w, _ in fcs]).astype(jnp.bfloat16)
    b3 = jnp.stack([b for _, b in fcs]).astype(jnp.float32)

    return dict(w1=w1, b1=b1, w2=w2, b2=b2, w3=w3, b3=b3,
                middle_size=middle_size, center_size=center_size,
                n_out=n, n_pad=n_pad)


# --------------------------------- forward ----------------------------------

def _pick_batch_tile(b_pad):
    for t in (256, 128, 64, 32, 16, 8):
        if b_pad % t == 0:
            return t
    return b_pad


def branched_head_forward(p, x):
    mid, csz, n_pad = p["middle_size"], p["center_size"], p["n_pad"]
    n1 = 3 * mid + csz
    B, K = x.shape

    # Pad batch to a sublane multiple so batch tiles satisfy the (8,128) rule.
    b_pad = -(-B // 8) * 8
    if b_pad != B:
        x = jnp.zeros((b_pad, K), x.dtype).at[:B].set(x)
    tb = _pick_batch_tile(b_pad)
    grid = (b_pad // tb,)

    x_bf = x.astype(jnp.bfloat16)
    kernel = functools.partial(_branched_head_kernel, mid=mid)

    out = pl.pallas_call(
        kernel,
        out_shape=jax.ShapeDtypeStruct((3, b_pad, n_pad), jnp.float32),
        grid=grid,
        in_specs=[
            pl.BlockSpec((tb, K), lambda i: (i, 0)),        # x: batch tile
            pl.BlockSpec((K, n1), lambda i: (0, 0)),        # w1 (resident)
            pl.BlockSpec((1, n1), lambda i: (0, 0)),        # b1
            pl.BlockSpec((csz, mid), lambda i: (0, 0)),     # w2 (resident)
            pl.BlockSpec((1, mid), lambda i: (0, 0)),       # b2
            pl.BlockSpec((3, mid, n_pad), lambda i: (0, 0, 0)),  # w3
            pl.BlockSpec((3, 1, n_pad), lambda i: (0, 0, 0)),    # b3
        ],
        out_specs=pl.BlockSpec((3, tb, n_pad), lambda i: (0, i, 0)),
        scratch_shapes=[
            pltpu.VMEM((tb, n1), jnp.float32),              # h1 (gr|vd|cd|c0)
            pltpu.VMEM((tb, mid), jnp.float32),             # center
        ],
        compiler_params=pltpu.CompilerParams(
            dimension_semantics=("parallel",)),
    )(x_bf, p["w1"], p["b1"], p["w2"], p["b2"], p["w3"], p["b3"])

    return out[:, :B, :p["n_out"]]


# -------------------------- references for checking --------------------------

def _forward_ref_bf16(p, x):
    """Same math as the kernel (same bf16 casts), in plain XLA."""
    mid = p["middle_size"]
    h1 = jnp.maximum(jnp.dot(x.astype(jnp.bfloat16), p["w1"],
                             preferred_element_type=jnp.float32) + p["b1"], 0.0)
    c0 = h1[:, 3 * mid:].astype(jnp.bfloat16)
    center = jnp.maximum(jnp.dot(c0, p["w2"],
                                 preferred_element_type=jnp.float32) + p["b2"], 0.0)
    outs = []
    for br in range(3):
        a = (h1[:, br * mid:(br + 1) * mid] + center).astype(jnp.bfloat16)
        outs.append(jnp.dot(a, p["w3"][br],
                            preferred_element_type=jnp.float32) + p["b3"][br])
    return jnp.stack(outs, 0)[:, :, :p["n_out"]]


def _torch_ref_f32(raw, x):
    """Float32 reference matching the original PyTorch module in eval mode."""
    def head(h, xx):
        y = xx @ h["w"].T + h["b"]
        scale = h["gamma"] / jnp.sqrt(h["var"] + _BN_EPS)
        return jnp.maximum(y * scale + h["beta"] - h["mean"] * scale, 0.0)

    gr = head(raw["gr1"], x)
    vd = head(raw["vd1"], x)
    cd = head(raw["cd1"], x)
    center = head(raw["center1"], head(raw["center0"], x))
    g = (gr + center) @ raw["fc_gr"][0].T + raw["fc_gr"][1]
    v = (vd + center) @ raw["fc_vd"][0].T + raw["fc_vd"][1]
    c = (cd + center) @ raw["fc_cd"][0].T + raw["fc_cd"][1]
    return jnp.stack([g, v, c], 0)


# ----------------------------------- main ------------------------------------

if __name__ == "__main__":
    conf = types.SimpleNamespace(gr_size=8, vd_size=8, cd_size=8)
    batch, input_size = 8, 32

    key = jax.random.PRNGKey(0)
    kx, kp = jax.random.split(key)
    x = jax.random.normal(kx, (batch, input_size), jnp.float32)

    raw = init_branched_head(kp, conf, input_size)
    params = prepare_params(raw, conf)

    fwd = jax.jit(lambda xx: branched_head_forward(params, xx))
    out = jax.block_until_ready(fwd(x))
    assert out.shape == (3, batch, conf.gr_size), out.shape

    # Tight check vs a reference that applies the identical bf16 casting.
    ref_bf = _forward_ref_bf16(params, x)
    assert jnp.allclose(out, ref_bf, atol=1e-2, rtol=1e-2), "mismatch vs bf16 reference"

    # Sanity check vs the full-f32 PyTorch-equivalent math (bf16 weights ->
    # loose tolerance).
    ref_f32 = _torch_ref_f32(raw, x)
    assert jnp.allclose(out, ref_f32, atol=1e-1, rtol=1e-1), "mismatch vs f32 reference"

    # TODO(synk): training-mode BatchNorm statistics / Dropout masks are not
    # implemented (eval-mode semantics only, matching module.eval()).
    print("KERNEL_OK")
</pallas_src>

<mosaic_0001>
module attributes {stable_mosaic.version = 11 : i64} {
  func.func @_branched_head_kernel(%arg0: i32, %arg1: memref<8x32xbf16, #tpu.memory_space<vmem>>, %arg2: memref<32x2816xbf16, #tpu.memory_space<vmem>>, %arg3: memref<1x2816xf32, #tpu.memory_space<vmem>>, %arg4: memref<1280x512xbf16, #tpu.memory_space<vmem>>, %arg5: memref<1x512xf32, #tpu.memory_space<vmem>>, %arg6: memref<3x512x128xbf16, #tpu.memory_space<vmem>>, %arg7: memref<3x1x128xf32, #tpu.memory_space<vmem>>, %arg8: memref<3x8x128xf32, #tpu.memory_space<vmem>>, %arg9: memref<8x2816xf32, #tpu.memory_space<vmem>>, %arg10: memref<8x512xf32, #tpu.memory_space<vmem>>) attributes {dimension_semantics = [#tpu.dimension_semantics<parallel>], iteration_bounds = array<i64: 1>, scalar_prefetch = 0 : i64, scratch_operands = 2 : i64, tpu.core_type = #tpu.core_type<tc>, window_params = [{transform_indices = @transform_0, window_bounds = array<i64: 8, 32>}, {pipeline_mode = #tpu.pipeline_mode<synchronous>, transform_indices = @transform_1, window_bounds = array<i64: 32, 2816>}, {pipeline_mode = #tpu.pipeline_mode<synchronous>, transform_indices = @transform_2, window_bounds = array<i64: 1, 2816>}, {pipeline_mode = #tpu.pipeline_mode<synchronous>, transform_indices = @transform_3, window_bounds = array<i64: 1280, 512>}, {pipeline_mode = #tpu.pipeline_mode<synchronous>, transform_indices = @transform_4, window_bounds = array<i64: 1, 512>}, {pipeline_mode = #tpu.pipeline_mode<synchronous>, transform_indices = @transform_5, window_bounds = array<i64: 3, 512, 128>}, {pipeline_mode = #tpu.pipeline_mode<synchronous>, transform_indices = @transform_6, window_bounds = array<i64: 3, 1, 128>}, {transform_indices = @transform_7, window_bounds = array<i64: 3, 8, 128>}]} {
    %c0 = arith.constant 0 : index
    %c0_0 = arith.constant 0 : index
    %0 = vector.load %arg1[%c0, %c0_0] : memref<8x32xbf16, #tpu.memory_space<vmem>>, vector<8x32xbf16>
    %c0_1 = arith.constant 0 : index
    %c0_2 = arith.constant 0 : index
    %1 = vector.load %arg2[%c0_1, %c0_2] : memref<32x2816xbf16, #tpu.memory_space<vmem>>, vector<32x2816xbf16>
    %cst = arith.constant dense<0.000000e+00> : vector<8x2816xf32>
    %2 = tpu.matmul %0, %1, %cst {dimension_numbers = #tpu.dot_dimension_numbers<[1], [0], [0], [1], [0, 0, 1, 1], [], []>} : vector<8x32xbf16>, vector<32x2816xbf16>, vector<8x2816xf32> -> vector<8x2816xf32>
    %c0_3 = arith.constant 0 : index
    %c0_4 = arith.constant 0 : index
    %3 = vector.load %arg3[%c0_3, %c0_4] : memref<1x2816xf32, #tpu.memory_space<vmem>>, vector<1x2816xf32>
    %4 = vector.broadcast %3 : vector<1x2816xf32> to vector<8x2816xf32>
    %5 = arith.addf %2, %4 : vector<8x2816xf32>
    %cst_5 = arith.constant 0.000000e+00 : f32
    %6 = vector.broadcast %cst_5 : f32 to vector<8x2816xf32>
    %7 = arith.maximumf %5, %6 : vector<8x2816xf32>
    %c0_6 = arith.constant 0 : index
    %c0_7 = arith.constant 0 : index
    %8 = vector.load %arg9[%c0_6, %c0_7] : memref<8x2816xf32, #tpu.memory_space<vmem>>, vector<8x2816xf32>
    tpu.vector_store %arg9[%c0_6, %c0_7], %7 {strides = array<i32>} : memref<8x2816xf32, #tpu.memory_space<vmem>>, vector<8x2816xf32>,
    %c0_8 = arith.constant 0 : index
    %c1536 = arith.constant 1536 : index
    %9 = vector.load %arg9[%c0_8, %c1536] : memref<8x2816xf32, #tpu.memory_space<vmem>>, vector<8x1280xf32>
    %10 = arith.truncf %9 : vector<8x1280xf32> to vector<8x1280xbf16>
    %c0_9 = arith.constant 0 : index
    %c0_10 = arith.constant 0 : index
    %11 = vector.load %arg4[%c0_9, %c0_10] : memref<1280x512xbf16, #tpu.memory_space<vmem>>, vector<1280x512xbf16>
    %cst_11 = arith.constant dense<0.000000e+00> : vector<8x512xf32>
    %12 = tpu.matmul %10, %11, %cst_11 {dimension_numbers = #tpu.dot_dimension_numbers<[1], [0], [0], [1], [0, 0, 1, 1], [], []>} : vector<8x1280xbf16>, vector<1280x512xbf16>, vector<8x512xf32> -> vector<8x512xf32>
    %c0_12 = arith.constant 0 : index
    %c0_13 = arith.constant 0 : index
    %13 = vector.load %arg5[%c0_12, %c0_13] : memref<1x512xf32, #tpu.memory_space<vmem>>, vector<1x512xf32>
    %14 = vector.broadcast %13 : vector<1x512xf32> to vector<8x512xf32>
    %15 = arith.addf %12, %14 : vector<8x512xf32>
    %cst_14 = arith.constant 0.000000e+00 : f32
    %16 = vector.broadcast %cst_14 : f32 to vector<8x512xf32>
    %17 = arith.maximumf %15, %16 : vector<8x512xf32>
    %c0_15 = arith.constant 0 : index
    %c0_16 = arith.constant 0 : index
    %18 = vector.load %arg10[%c0_15, %c0_16] : memref<8x512xf32, #tpu.memory_space<vmem>>, vector<8x512xf32>
    tpu.vector_store %arg10[%c0_15, %c0_16], %17 {strides = array<i32>} : memref<8x512xf32, #tpu.memory_space<vmem>>, vector<8x512xf32>,
    %c0_17 = arith.constant 0 : index
    %c0_18 = arith.constant 0 : index
    %19 = vector.load %arg10[%c0_17, %c0_18] : memref<8x512xf32, #tpu.memory_space<vmem>>, vector<8x512xf32>
    %c0_19 = arith.constant 0 : index
    %c0_20 = arith.constant 0 : index
    %20 = vector.load %arg9[%c0_19, %c0_20] : memref<8x2816xf32, #tpu.memory_space<vmem>>, vector<8x512xf32>
    %21 = arith.addf %20, %19 : vector<8x512xf32>
    %22 = arith.truncf %21 : vector<8x512xf32> to vector<8x512xbf16>
    %c0_21 = arith.constant 0 : index
    %c0_22 = arith.constant 0 : index
    %c0_23 = arith.constant 0 : index
    %23 = vector.load %arg6[%c0_21, %c0_22, %c0_23] : memref<3x512x128xbf16, #tpu.memory_space<vmem>>, vector<1x512x128xbf16>
    %24 = vector.shape_cast %23 : vector<1x512x128xbf16> to vector<512x128xbf16>
    %cst_24 = arith.constant dense<0.000000e+00> : vector<8x128xf32>
    %25 = tpu.matmul %22, %24, %cst_24 {dimension_numbers = #tpu.dot_dimension_numbers<[1], [0], [0], [1], [0, 0, 1, 1], [], []>} : vector<8x512xbf16>, vector<512x128xbf16>, vector<8x128xf32> -> vector<8x128xf32>
    %c0_25 = arith.constant 0 : index
    %c0_26 = arith.constant 0 : index
    %c0_27 = arith.constant 0 : index
    %26 = vector.load %arg7[%c0_25, %c0_26, %c0_27] : memref<3x1x128xf32, #tpu.memory_space<vmem>>, vector<1x1x128xf32>
    %27 = vector.shape_cast %26 : vector<1x1x128xf32> to vector<1x128xf32>
    %28 = vector.broadcast %27 : vector<1x128xf32> to vector<8x128xf32>
    %29 = arith.addf %25, %28 : vector<8x128xf32>
    %c0_28 = arith.constant 0 : index
    %c0_29 = arith.constant 0 : index
    %c0_30 = arith.constant 0 : index
    %30 = vector.load %arg8[%c0_28, %c0_29, %c0_30] : memref<3x8x128xf32, #tpu.memory_space<vmem>>, vector<1x8x128xf32>
    %31 = vector.shape_cast %30 : vector<1x8x128xf32> to vector<8x128xf32>
    %32 = vector.shape_cast %29 : vector<8x128xf32> to vector<1x8x128xf32>
    tpu.vector_store %arg8[%c0_28, %c0_29, %c0_30], %32 {strides = array<i32>} : memref<3x8x128xf32, #tpu.memory_space<vmem>>, vector<1x8x128xf32>,
    %c0_31 = arith.constant 0 : index
    %c512 = arith.constant 512 : index
    %33 = vector.load %arg9[%c0_31, %c512] : memref<8x2816xf32, #tpu.memory_space<vmem>>, vector<8x512xf32>
    %34 = arith.addf %33, %19 : vector<8x512xf32>
    %35 = arith.truncf %34 : vector<8x512xf32> to vector<8x512xbf16>
    %c1 = arith.constant 1 : index
    %c0_32 = arith.constant 0 : index
    %c0_33 = arith.constant 0 : index
    %36 = vector.load %arg6[%c1, %c0_32, %c0_33] : memref<3x512x128xbf16, #tpu.memory_space<vmem>>, vector<1x512x128xbf16>
    %37 = vector.shape_cast %36 : vector<1x512x128xbf16> to vector<512x128xbf16>
    %cst_34 = arith.constant dense<0.000000e+00> : vector<8x128xf32>
    %38 = tpu.matmul %35, %37, %cst_34 {dimension_numbers = #tpu.dot_dimension_numbers<[1], [0], [0], [1], [0, 0, 1, 1], [], []>} : vector<8x512xbf16>, vector<512x128xbf16>, vector<8x128xf32> -> vector<8x128xf32>
    %c1_35 = arith.constant 1 : index
    %c0_36 = arith.constant 0 : index
    %c0_37 = arith.constant 0 : index
    %39 = vector.load %arg7[%c1_35, %c0_36, %c0_37] : memref<3x1x128xf32, #tpu.memory_space<vmem>>, vector<1x1x128xf32>
    %40 = vector.shape_cast %39 : vector<1x1x128xf32> to vector<1x128xf32>
    %41 = vector.broadcast %40 : vector<1x128xf32> to vector<8x128xf32>
    %42 = arith.addf %38, %41 : vector<8x128xf32>
    %c1_38 = arith.constant 1 : index
    %c0_39 = arith.constant 0 : index
    %c0_40 = arith.constant 0 : index
    %43 = vector.load %arg8[%c1_38, %c0_39, %c0_40] : memref<3x8x128xf32, #tpu.memory_space<vmem>>, vector<1x8x128xf32>
    %44 = vector.shape_cast %43 : vector<1x8x128xf32> to vector<8x128xf32>
    %45 = vector.shape_cast %42 : vector<8x128xf32> to vector<1x8x128xf32>
    tpu.vector_store %arg8[%c1_38, %c0_39, %c0_40], %45 {strides = array<i32>} : memref<3x8x128xf32, #tpu.memory_space<vmem>>, vector<1x8x128xf32>,
    %c0_41 = arith.constant 0 : index
    %c1024 = arith.constant 1024 : index
    %46 = vector.load %arg9[%c0_41, %c1024] : memref<8x2816xf32, #tpu.memory_space<vmem>>, vector<8x512xf32>
    %47 = arith.addf %46, %19 : vector<8x512xf32>
    %48 = arith.truncf %47 : vector<8x512xf32> to vector<8x512xbf16>
    %c2 = arith.constant 2 : index
    %c0_42 = arith.constant 0 : index
    %c0_43 = arith.constant 0 : index
    %49 = vector.load %arg6[%c2, %c0_42, %c0_43] : memref<3x512x128xbf16, #tpu.memory_space<vmem>>, vector<1x512x128xbf16>
    %50 = vector.shape_cast %49 : vector<1x512x128xbf16> to vector<512x128xbf16>
    %cst_44 = arith.constant dense<0.000000e+00> : vector<8x128xf32>
    %51 = tpu.matmul %48, %50, %cst_44 {dimension_numbers = #tpu.dot_dimension_numbers<[1], [0], [0], [1], [0, 0, 1, 1], [], []>} : vector<8x512xbf16>, vector<512x128xbf16>, vector<8x128xf32> -> vector<8x128xf32>
    %c2_45 = arith.constant 2 : index
    %c0_46 = arith.constant 0 : index
    %c0_47 = arith.constant 0 : index
    %52 = vector.load %arg7[%c2_45, %c0_46, %c0_47] : memref<3x1x128xf32, #tpu.memory_space<vmem>>, vector<1x1x128xf32>
    %53 = vector.shape_cast %52 : vector<1x1x128xf32> to vector<1x128xf32>
    %54 = vector.broadcast %53 : vector<1x128xf32> to vector<8x128xf32>
    %55 = arith.addf %51, %54 : vector<8x128xf32>
    %c2_48 = arith.constant 2 : index
    %c0_49 = arith.constant 0 : index
    %c0_50 = arith.constant 0 : index
    %56 = vector.load %arg8[%c2_48, %c0_49, %c0_50] : memref<3x8x128xf32, #tpu.memory_space<vmem>>, vector<1x8x128xf32>
    %57 = vector.shape_cast %56 : vector<1x8x128xf32> to vector<8x128xf32>
    %58 = vector.shape_cast %55 : vector<8x128xf32> to vector<1x8x128xf32>
    tpu.vector_store %arg8[%c2_48, %c0_49, %c0_50], %58 {strides = array<i32>} : memref<3x8x128xf32, #tpu.memory_space<vmem>>, vector<1x8x128xf32>,
    return
  }
  func.func @transform_0(%arg0: i32) -> (i32, i32) {
    %c0_i32 = arith.constant 0 : i32
    %c0_i32_0 = arith.constant 0 : i32
    return %arg0, %c0_i32 : i32, i32
  }
  func.func @transform_1(%arg0: i32) -> (i32, i32) {
    %c0_i32 = arith.constant 0 : i32
    %c0_i32_0 = arith.constant 0 : i32
    %c0_i32_1 = arith.constant 0 : i32
    return %c0_i32, %c0_i32_0 : i32, i32
  }
  func.func @transform_2(%arg0: i32) -> (i32, i32) {
    %c0_i32 = arith.constant 0 : i32
    %c0_i32_0 = arith.constant 0 : i32
    %c0_i32_1 = arith.constant 0 : i32
    return %c0_i32, %c0_i32_0 : i32, i32
  }
  func.func @transform_3(%arg0: i32) -> (i32, i32) {
    %c0_i32 = arith.constant 0 : i32
    %c0_i32_0 = arith.constant 0 : i32
    %c0_i32_1 = arith.constant 0 : i32
    return %c0_i32, %c0_i32_0 : i32, i32
  }
  func.func @transform_4(%arg0: i32) -> (i32, i32) {
    %c0_i32 = arith.constant 0 : i32
    %c0_i32_0 = arith.constant 0 : i32
    %c0_i32_1 = arith.constant 0 : i32
    return %c0_i32, %c0_i32_0 : i32, i32
  }
  func.func @transform_5(%arg0: i32) -> (i32, i32, i32) {
    %c0_i32 = arith.constant 0 : i32
    %c0_i32_0 = arith.constant 0 : i32
    %c0_i32_1 = arith.constant 0 : i32
    %c0_i32_2 = arith.constant 0 : i32
    return %c0_i32, %c0_i32_0, %c0_i32_1 : i32, i32, i32
  }
  func.func @transform_6(%arg0: i32) -> (i32, i32, i32) {
    %c0_i32 = arith.constant 0 : i32
    %c0_i32_0 = arith.constant 0 : i32
    %c0_i32_1 = arith.constant 0 : i32
    %c0_i32_2 = arith.constant 0 : i32
    return %c0_i32, %c0_i32_0, %c0_i32_1 : i32, i32, i32
  }
  func.func @transform_7(%arg0: i32) -> (i32, i32, i32) {
    %c0_i32 = arith.constant 0 : i32
    %c0_i32_0 = arith.constant 0 : i32
    %c0_i32_1 = arith.constant 0 : i32
    return %c0_i32, %arg0, %c0_i32_0 : i32, i32, i32
  }
}

</mosaic_0001>

<bundles_post_ra>
// kernel: _lambda_.1
= control target key start
LH: loop header
LB: loop body
LE: loop exit
PB: predicated region body
PF: predicated region fallthrough
CT: control target
= control target key end

     0   :  { %v5826_v2 = vmov 0   ;;  %vm409_vm0 = vcmask 261120   ;;  %s7470_s0 = inlined_call_operand.vmem [shape: bf16[8,32], index: 0, kind: input, shape index: {}]   ;;  %s7471_s1 = inlined_call_operand.vmem [shape: bf16[32,2816], index: 1, kind: input, shape index: {}]   ;;  %s7472_s2 = inlined_call_operand.vmem [shape: f32[1,2816], index: 2, kind: input, shape index: {}]   ;;  %s7473_s3 = inlined_call_operand.vmem [shape: bf16[1280,512], index: 3, kind: input, shape index: {}]   ;;  %s7474_s4 = inlined_call_operand.vmem [shape: f32[1,512], index: 4, kind: input, shape index: {}]   ;;  %s7475_s5 = inlined_call_operand.vmem [shape: bf16[3,512,128], index: 5, kind: input, shape index: {}]   ;;  %s7476_s6 = inlined_call_operand.vmem [shape: f32[3,1,128], index: 6, kind: input, shape index: {}]   ;;  %s7477_s7 = inlined_call_operand.hbm [shape: f32[3,8,128], index: 7, kind: output, shape index: {}]  }
   0x1   :  { %v5158_v0 = vld [vmem:[%s7471_s1 + $0x4] ss:$88 sps:$4 sm:$0xff]   ;;  %v5160_v1 = vld [vmem:[%s7471_s1] ss:$88 sps:$4 sm:$0xff]   ;;  %445 = vmatprep.mubr.bf16.mxu0 %v5826_v2  ;;  %486 = vmatprep.mubr.bf16.mxu1 %v5826_v2  ;;  %v5161_v3 = vld [vmem:[%s7471_s1 + $0xb4] ss:$88 sps:$4 sm:$0xff]  }
   0x2   :  { %413 = vmatprep.subr.bf16.mxu0 %v5158_v0  ;;  %v5163_v4 = vld [vmem:[%s7471_s1 + $0xb0] ss:$88 sps:$4 sm:$0xff]   ;;  %v5166_v5 = vld [vmem:[%s7471_s1 + $0x14] ss:$88 sps:$4 sm:$0xff]   ;;  %v5890_v6 = vld [vmem:[%s7470_s0] sm:$0xf] }
   0x3   :  { %414 = vmatpush1.bf16.msra.mxu0 %v5160_v1  ;;  %v5164_v7 = vld [vmem:[%s7471_s1 + $0x10] ss:$88 sps:$4 sm:$0xff]   ;;  %v5169_v8 = vld [vmem:[%s7471_s1 + $0xc4] ss:$88 sps:$4 sm:$0xff]   ;;  %v5167_v9 = vld [vmem:[%s7471_s1 + $0xc0] ss:$88 sps:$4 sm:$0xff]  }
   0x4   :  { %415 = vmatprep.subr.bf16.mxu0 %v5161_v3  ;;  %v5172_v10 = vld [vmem:[%s7471_s1 + $0x24] ss:$88 sps:$4 sm:$0xff]   ;;  %v5184_v12 = vld [vmem:[%s7471_s1 + $0x8] ss:$88 sps:$4 sm:$0xff]   ;;  %v5187_v15 = vld [vmem:[%s7471_s1 + $0xb8] ss:$88 sps:$4 sm:$0xff]  }
   0x5   :  { %v5182_v11 = vld [vmem:[%s7471_s1 + $0xc] ss:$88 sps:$4 sm:$0xff]   ;;  %v5185_v13 = vld [vmem:[%s7471_s1 + $0xbc] ss:$88 sps:$4 sm:$0xff]   ;;  %v5170_v14 = vld [vmem:[%s7471_s1 + $0x20] ss:$88 sps:$4 sm:$0xff]  }
   0x6   :  { %454 = vmatprep.subr.bf16.mxu1 %v5182_v11  ;;  %v5175_v16 = vld [vmem:[%s7471_s1 + $0xd4] ss:$88 sps:$4 sm:$0xff]   ;;  %v5173_v18 = vld [vmem:[%s7471_s1 + $0xd0] ss:$88 sps:$4 sm:$0xff]   ;;  %v5181_v24 = vld [vmem:[%s7471_s1 + $0xe4] ss:$88 sps:$4 sm:$0xff]  }
   0x7   :  { %416 = vmatpush1.bf16.msra.mxu0 %v5163_v4  ;;  %455 = vmatpush1.bf16.msra.mxu1 %v5184_v12  ;;  %v5190_v17 = vld [vmem:[%s7471_s1 + $0x1c] ss:$88 sps:$4 sm:$0xff]   ;;  %v5188_v19 = vld [vmem:[%s7471_s1 + $0x18] ss:$88 sps:$4 sm:$0xff]   ;;  %v5193_v20 = vld [vmem:[%s7471_s1 + $0xcc] ss:$88 sps:$4 sm:$0xff]  }
   0x8   :  { %495 = vmatprep.subr.bf16.mxu0 %v5166_v5  ;;  %456 = vmatprep.subr.bf16.mxu1 %v5185_v13  ;;  %v5178_v21 = vld [vmem:[%s7471_s1 + $0x34] ss:$88 sps:$4 sm:$0xff]   ;;  %v5176_v22 = vld [vmem:[%s7471_s1 + $0x30] ss:$88 sps:$4 sm:$0xff]   ;;  %v5179_v26 = vld [vmem:[%s7471_s1 + $0xe0] ss:$88 sps:$4 sm:$0xff]  }
   0x9   :  { %v5191_v23 = vld [vmem:[%s7471_s1 + $0xc8] ss:$88 sps:$4 sm:$0xff]   ;;  %v5196_v25 = vld [vmem:[%s7471_s1 + $0x2c] ss:$88 sps:$4 sm:$0xff]   ;;  %v5199_v28 = vld [vmem:[%s7471_s1 + $0xdc] ss:$88 sps:$4 sm:$0xff]  }
   0xa   :  { %4426 = vmatmul.mubr.msk.bf16.vlgmr.msra.gmra.mrb[0].mxu0 %vm409_vm0, %v5890_v6  ;;  %v5194_v27 = vld [vmem:[%s7471_s1 + $0x28] ss:$88 sps:$4 sm:$0xff]   ;;  %v5208_v29 = vld [vmem:[%s7471_s1 + $0x44] ss:$88 sps:$4 sm:$0xff]   ;;  %v5197_v30 = vld [vmem:[%s7471_s1 + $0xd8] ss:$88 sps:$4 sm:$0xff]  }
   0xb   :  { %496 = vmatpush1.bf16.msra.mxu0 %v5164_v7  ;;  %527 = vmatprep.mubr.bf16.mxu0 %v5826_v2  ;;  %v5202_v31 = vld [vmem:[%s7471_s1 + $0x3c] ss:$88 sps:$4 sm:$0xff]   ;;  %v5206_v32 = vld [vmem:[%s7471_s1 + $0x40] ss:$88 sps:$4 sm:$0xff]   ;;  %v5205_v35 = vld [vmem:[%s7471_s1 + $0xec] ss:$88 sps:$4 sm:$0xff]  }
   0xc   :  { %497 = vmatprep.subr.bf16.mxu0 %v5169_v8  ;;  %457 = vmatpush1.bf16.msra.mxu1 %v5187_v15  ;;  %v5211_v33 = vld [vmem:[%s7471_s1 + $0xf4] ss:$88 sps:$4 sm:$0xff]   ;;  %v5200_v34 = vld [vmem:[%s7471_s1 + $0x38] ss:$88 sps:$4 sm:$0xff]   ;;  %v5203_v38 = vld [vmem:[%s7471_s1 + $0xe8] ss:$88 sps:$4 sm:$0xff]  }
   0xd   :  { %536 = vmatprep.subr.bf16.mxu1 %v5190_v17  ;;  %v5209_v36 = vld [vmem:[%s7471_s1 + $0xf0] ss:$88 sps:$4 sm:$0xff]   ;;  %v5217_v37 = vld [vmem:[%s7471_s1 + $0x54] ss:$88 sps:$4 sm:$0xff]   ;;  %v5223_v41 = vld [vmem:[%s7471_s1 + $0x104] ss:$88 sps:$4 sm:$0xff]  }
   0xe   :  { %v5214_v39 = vld [vmem:[%s7471_s1 + $0x4c] ss:$88 sps:$4 sm:$0xff]   ;;  %v5215_v40 = vld [vmem:[%s7471_s1 + $0x50] ss:$88 sps:$4 sm:$0xff]   ;;  %v5220_v43 = vld [vmem:[%s7471_s1 + $0xfc] ss:$88 sps:$4 sm:$0xff]  }
   0xf   :  { %498 = vmatpush1.bf16.msra.mxu0 %v5167_v9  ;;  %4427 = vmatmul.mubr.msk.bf16.vlgmr.msra.gmra.mrb[0].mxu1 %vm409_vm0, %v5890_v6  ;;  %v5212_v42 = vld [vmem:[%s7471_s1 + $0x48] ss:$88 sps:$4 sm:$0xff]   ;;  %v5229_v45 = vld [vmem:[%s7473_s3 + $0xc] ss:$16 sps:$4 sm:$0xff]   ;;  %v5218_v46 = vld [vmem:[%s7471_s1 + $0xf8] ss:$88 sps:$4 sm:$0xff]  }
  0x10   :  { %577 = vmatprep.subr.bf16.mxu0 %v5172_v10  ;;  %537 = vmatpush1.bf16.msra.mxu1 %v5188_v19  ;;  %v5221_v44 = vld [vmem:[%s7471_s1 + $0x100] ss:$88 sps:$4 sm:$0xff]   ;;  %v5226_v47 = vld [vmem:[%s7473_s3 + $0x4] ss:$16 sps:$4 sm:$0xff]   ;;  %v5235_v49 = vld [vmem:[%s7473_s3 + $0x2c] ss:$16 sps:$4 sm:$0xff]  }
  0x11   :  { %568 = vmatprep.mubr.bf16.mxu1 %v5826_v2  ;;  %538 = vmatprep.subr.bf16.mxu1 %v5193_v20  ;;  %v5227_v48 = vld [vmem:[%s7473_s3 + $0x8] ss:$16 sps:$4 sm:$0xff]   ;;  %v5224_v50 = vld [vmem:[%s7473_s3] ss:$16 sps:$4 sm:$0xff]   ;;  %v5232_v51 = vld [vmem:[%s7473_s3 + $0x24] ss:$16 sps:$4 sm:$0xff]  }
  0x12   :  { %4428 = vmatmul.mubr.msk.bf16.vlgmr.msra.gmra.mrb[4].mxu0 %vm409_vm0, %v5890_v6  ;;  %v5233_v52 = vld [vmem:[%s7473_s3 + $0x28] ss:$16 sps:$4 sm:$0xff]   ;;  %v5241_v53 = vld [vmem:[%s7473_s3 + $0x4c] ss:$16 sps:$4 sm:$0xff]   ;;  %v5230_v54 = vld [vmem:[%s7473_s3 + $0x20] ss:$16 sps:$4 sm:$0xff]  }
  0x13   :  { %578 = vmatpush1.bf16.msra.mxu0 %v5170_v14  ;;  %609 = vmatprep.mubr.bf16.mxu0 %v5826_v2  ;;  %v5238_v55 = vld [vmem:[%s7473_s3 + $0x44] ss:$16 sps:$4 sm:$0xff]   ;;  %v5239_v56 = vld [vmem:[%s7473_s3 + $0x48] ss:$16 sps:$4 sm:$0xff]   ;;  %v5247_v57 = vld [vmem:[%s7473_s3 + $0x6c] ss:$16 sps:$4 sm:$0xff]  }
  0x14   :  { %579 = vmatprep.subr.bf16.mxu0 %v5175_v16  ;;  %539 = vmatpush1.bf16.msra.mxu1 %v5191_v23  ;;  %v5236_v58 = vld [vmem:[%s7473_s3 + $0x40] ss:$16 sps:$4 sm:$0xff]   ;;  %v5244_v59 = vld [vmem:[%s7473_s3 + $0x64] ss:$16 sps:$4 sm:$0xff]   ;;  %v5245_v60 = vld [vmem:[%s7473_s3 + $0x68] ss:$16 sps:$4 sm:$0xff]  }
  0x15   :  { %618 = vmatprep.subr.bf16.mxu1 %v5196_v25  ;;  %v5253_v61 = vld [vmem:[%s7473_s3 + $0x8c] ss:$16 sps:$4 sm:$0xff]   ;;  %v5242_v62 = vld [vmem:[%s7473_s3 + $0x60] ss:$16 sps:$4 sm:$0xff]   ;;  %v5250_v63 = vld [vmem:[%s7473_s3 + $0x84] ss:$16 sps:$4 sm:$0xff]  }
  0x16   :  { %v5251_v0 = vld [vmem:[%s7473_s3 + $0x88] ss:$16 sps:$4 sm:$0xff]   ;;  %v5259_v1 = vld [vmem:[%s7473_s3 + $0xac] ss:$16 sps:$4 sm:$0xff]   ;;  %v5256_v3 = vld [vmem:[%s7473_s3 + $0xa4] ss:$16 sps:$4 sm:$0xff]  }
  0x17   :  { %580 = vmatpush1.bf16.msra.mxu0 %v5173_v18  ;;  %4429 = vmatmul.mubr.msk.bf16.vlgmr.msra.gmra.mrb[4].mxu1 %vm409_vm0, %v5890_v6  ;;  %v5257_v4 = vld [vmem:[%s7473_s3 + $0xa8] ss:$16 sps:$4 sm:$0xff]   ;;  %v5265_v5 = vld [vmem:[%s7473_s3 + $0xcc] ss:$16 sps:$4 sm:$0xff]   ;;  %v5262_v7 = vld [vmem:[%s7473_s3 + $0xc4] ss:$16 sps:$4 sm:$0xff]  }
  0x18   :  { %659 = vmatprep.subr.bf16.mxu0 %v5178_v21  ;;  %619 = vmatpush1.bf16.msra.mxu1 %v5194_v27  ;;  %v5263_v8 = vld [vmem:[%s7473_s3 + $0xc8] ss:$16 sps:$4 sm:$0xff]   ;;  %v5271_v9 = vld [vmem:[%s7473_s3 + $0xec] ss:$16 sps:$4 sm:$0xff]   ;;  %v5260_v10 = vld [vmem:[%s7473_s3 + $0xc0] ss:$16 sps:$4 sm:$0xff]  }
  0x19   :  { %650 = vmatprep.mubr.bf16.mxu1 %v5826_v2  ;;  %620 = vmatprep.subr.bf16.mxu1 %v5199_v28  ;;  %v5268_v11 = vld [vmem:[%s7473_s3 + $0xe4] ss:$16 sps:$4 sm:$0xff]   ;;  %v5269_v12 = vld [vmem:[%s7473_s3 + $0xe8] ss:$16 sps:$4 sm:$0xff]   ;;  %v5266_v13 = vld [vmem:[%s7473_s3 + $0xe0] ss:$16 sps:$4 sm:$0xff]  }
  0x1a   :  { %4430 = vmatmul.mubr.msk.bf16.vlgmr.msra.gmra.mrb[8].mxu0 %vm409_vm0, %v5890_v6  ;;  %v5274_v14 = vld [vmem:[%s7473_s3 + $0x104] ss:$16 sps:$4 sm:$0xff]   ;;  %v5277_v15 = vld [vmem:[%s7473_s3 + $0x10c] ss:$16 sps:$4 sm:$0xff]   ;;  %v5272_v16 = vld [vmem:[%s7473_s3 + $0x100] ss:$16 sps:$4 sm:$0xff]  }
  0x1b   :  { %660 = vmatpush1.bf16.msra.mxu0 %v5176_v22  ;;  %691 = vmatprep.mubr.bf16.mxu0 %v5826_v2  ;;  %v5275_v17 = vld [vmem:[%s7473_s3 + $0x108] ss:$16 sps:$4 sm:$0xff]   ;;  %v5280_v18 = vld [vmem:[%s7473_s3 + $0x124] ss:$16 sps:$4 sm:$0xff]   ;;  %v5283_v19 = vld [vmem:[%s7473_s3 + $0x12c] ss:$16 sps:$4 sm:$0xff]  }
  0x1c   :  { %661 = vmatprep.subr.bf16.mxu0 %v5181_v24  ;;  %621 = vmatpush1.bf16.msra.mxu1 %v5197_v30  ;;  %v5278_v20 = vld [vmem:[%s7473_s3 + $0x120] ss:$16 sps:$4 sm:$0xff]   ;;  %v5281_v21 = vld [vmem:[%s7473_s3 + $0x128] ss:$16 sps:$4 sm:$0xff]   ;;  %v5286_v22 = vld [vmem:[%s7473_s3 + $0x144] ss:$16 sps:$4 sm:$0xff]  }
  0x1d   :  { %700 = vmatprep.subr.bf16.mxu1 %v5202_v31  ;;  %v5289_v23 = vld [vmem:[%s7473_s3 + $0x14c] ss:$16 sps:$4 sm:$0xff]   ;;  %v5284_v24 = vld [vmem:[%s7473_s3 + $0x140] ss:$16 sps:$4 sm:$0xff]   ;;  %v5287_v25 = vld [vmem:[%s7473_s3 + $0x148] ss:$16 sps:$4 sm:$0xff]  }
  0x1e   :  { %v5295_v27 = vld [vmem:[%s7473_s3 + $0x16c] ss:$16 sps:$4 sm:$0xff]   ;;  %v5290_v28 = vld [vmem:[%s7473_s3 + $0x160] ss:$16 sps:$4 sm:$0xff]   ;;  %v5298_v30 = vld [vmem:[%s7473_s3 + $0x184] ss:$16 sps:$4 sm:$0xff]  }
  0x1f   :  { %662 = vmatpush1.bf16.msra.mxu0 %v5179_v26  ;;  %4431 = vmatmul.mubr.msk.bf16.vlgmr.msra.gmra.mrb[8].mxu1 %vm409_vm0, %v5890_v6  ;;  %v5292_v26 = vld [vmem:[%s7473_s3 + $0x164] ss:$16 sps:$4 sm:$0xff]   ;;  %v5301_v31 = vld [vmem:[%s7473_s3 + $0x18c] ss:$16 sps:$4 sm:$0xff]  }
  0x20   :  { %741 = vmatprep.subr.bf16.mxu0 %v5208_v29  ;;  %701 = vmatpush1.bf16.msra.mxu1 %v5200_v34  ;;  %v5293_v29 = vld [vmem:[%s7473_s3 + $0x168] ss:$16 sps:$4 sm:$0xff]   ;;  %v5304_v34 = vld [vmem:[%s7473_s3 + $0x1a4] ss:$16 sps:$4 sm:$0xff]  }
  0x21   :  { %732 = vmatprep.mubr.bf16.mxu1 %v5826_v2  ;;  %702 = vmatprep.subr.bf16.mxu1 %v5205_v35  ;;  %v5307_v35 = vld [vmem:[%s7473_s3 + $0x1ac] ss:$16 sps:$4 sm:$0xff]  }
  0x22   :  { %4432 = vmatmul.mubr.msk.bf16.vlgmr.msra.gmra.mrb[12].mxu0 %vm409_vm0, %v5890_v6 }
  0x23   :  { %742 = vmatpush1.bf16.msra.mxu0 %v5206_v32  ;;  %773 = vmatprep.mubr.bf16.mxu0 %v5826_v2  ;;  %v5296_v32 = vld [vmem:[%s7473_s3 + $0x180] ss:$16 sps:$4 sm:$0xff]  }
  0x24   :  { %743 = vmatprep.subr.bf16.mxu0 %v5211_v33  ;;  %703 = vmatpush1.bf16.msra.mxu1 %v5203_v38  ;;  %v5299_v33 = vld [vmem:[%s7473_s3 + $0x188] ss:$16 sps:$4 sm:$0xff]   ;;  %v5310_v38 = vld [vmem:[%s7473_s3 + $0x1c4] ss:$16 sps:$4 sm:$0xff]  }
  0x25   :  { %782 = vmatprep.subr.bf16.mxu1 %v5214_v39  ;;  %v5313_v39 = vld [vmem:[%s7473_s3 + $0x1cc] ss:$16 sps:$4 sm:$0xff]  }
  0x27   :  { %744 = vmatpush1.bf16.msra.mxu0 %v5209_v36  ;;  %4433 = vmatmul.mubr.msk.bf16.vlgmr.msra.gmra.mrb[12].mxu1 %vm409_vm0, %v5890_v6  ;;  %v5302_v36 = vld [vmem:[%s7473_s3 + $0x1a0] ss:$16 sps:$4 sm:$0xff]  }
  0x28   :  { %823 = vmatprep.subr.bf16.mxu0 %v5217_v37  ;;  %783 = vmatpush1.bf16.msra.mxu1 %v5212_v42  ;;  %v5305_v37 = vld [vmem:[%s7473_s3 + $0x1a8] ss:$16 sps:$4 sm:$0xff]   ;;  %v5316_v42 = vld [vmem:[%s7473_s3 + $0x1e4] ss:$16 sps:$4 sm:$0xff]  }
  0x29   :  { %814 = vmatprep.mubr.bf16.mxu1 %v5826_v2  ;;  %784 = vmatprep.subr.bf16.mxu1 %v5220_v43  ;;  %v5319_v43 = vld [vmem:[%s7473_s3 + $0x1ec] ss:$16 sps:$4 sm:$0xff]  }
  0x2a   :  { %4434 = vmatmul.mubr.msk.bf16.vlgmr.msra.gmra.mrb[16].mxu0 %vm409_vm0, %v5890_v6 }
  0x2b   :  { %824 = vmatpush1.bf16.msra.mxu0 %v5215_v40  ;;  %855 = vmatprep.mubr.bf16.mxu0 %v5826_v2  ;;  %v5248_v2 = vld [vmem:[%s7473_s3 + $0x80] ss:$16 sps:$4 sm:$0xff]  }
  0x2c   :  { %825 = vmatprep.subr.bf16.mxu0 %v5223_v41  ;;  %785 = vmatpush1.bf16.msra.mxu1 %v5218_v46  ;;  %v5308_v40 = vld [vmem:[%s7473_s3 + $0x1c0] ss:$16 sps:$4 sm:$0xff]   ;;  %v5311_v41 = vld [vmem:[%s7473_s3 + $0x1c8] ss:$16 sps:$4 sm:$0xff]   ;;  %v5322_v46 = vld [vmem:[%s7473_s3 + $0x204] ss:$16 sps:$4 sm:$0xff]  }
  0x2d   :  { %2870 = vmatprep.subr.bf16.mxu1 %v5226_v47  ;;  %v5325_v47 = vld [vmem:[%s7473_s3 + $0x20c] ss:$16 sps:$4 sm:$0xff]  }
  0x2f   :  { %826 = vmatpush1.bf16.msra.mxu0 %v5221_v44  ;;  %4435 = vmatmul.mubr.msk.bf16.vlgmr.msra.gmra.mrb[16].mxu1 %vm409_vm0, %v5890_v6  ;;  %v5314_v44 = vld [vmem:[%s7473_s3 + $0x1e0] ss:$16 sps:$4 sm:$0xff]  }
  0x30   :  { %3075 = vmatprep.subr.bf16.mxu0 %v5229_v45  ;;  %2871 = vmatpush1.bf16.msra.mxu1 %v5224_v50  ;;  %v5317_v45 = vld [vmem:[%s7473_s3 + $0x1e8] ss:$16 sps:$4 sm:$0xff]  }
  0x31   :  { %2872 = vmatprep.subr.bf16.mxu1 %v5232_v51 }
  0x32   :  { %4436 = vmatmul.mubr.msk.bf16.vlgmr.msra.gmra.mrb[20].mxu0 %vm409_vm0, %v5890_v6  ;;  %v5254_v6 = vld [vmem:[%s7473_s3 + $0xa0] ss:$16 sps:$4 sm:$0xff]  }
  0x33   :  { %3076 = vmatpush1.bf16.msra.mxu0 %v5227_v48 }
  0x34   :  { %3077 = vmatprep.subr.bf16.mxu0 %v5235_v49  ;;  %2873 = vmatpush1.bf16.msra.mxu1 %v5230_v54 }
  0x35   :  { %2874 = vmatprep.subr.bf16.mxu1 %v5238_v55 }
  0x37   :  { %3078 = vmatpush1.bf16.msra.mxu0 %v5233_v52  ;;  %v79_v52 = vlaneseq }
  0x38   :  { %3079 = vmatprep.subr.bf16.mxu0 %v5241_v53  ;;  %2875 = vmatpush1.bf16.msra.mxu1 %v5236_v58 }
  0x39   :  { %2876 = vmatprep.subr.bf16.mxu1 %v5244_v59  ;;  %v6246_v55 = vshrl.u32 %v79_v52, 7  ;;  %v5335_v52 = vld [vmem:[%s7473_s3 + $0x248] ss:$16 sps:$4 sm:$0xff]  }
  0x3b   :  { %3080 = vmatpush1.bf16.msra.mxu0 %v5239_v56 }
  0x3c   :  { %3081 = vmatprep.subr.bf16.mxu0 %v5247_v57  ;;  %2877 = vmatpush1.bf16.msra.mxu1 %v5242_v62  ;;  %v109_v62 = vsub.s32 7, %v6246_v55 }
  0x3d   :  { %2878 = vmatprep.subr.bf16.mxu1 %v5250_v63 }
  0x3f   :  { %3082 = vmatpush1.bf16.msra.mxu0 %v5245_v60  ;;  %v105_v60 = vsub.s32 6, %v6246_v55 }
  0x40   :  { %3083 = vmatprep.subr.bf16.mxu0 %v5253_v61  ;;  %2879 = vmatpush1.bf16.msra.mxu1 %v5248_v2 }
  0x41   :  { %2880 = vmatprep.subr.bf16.mxu1 %v5256_v3 }
  0x43   :  { %3084 = vmatpush1.bf16.msra.mxu0 %v5251_v0  ;;  %v73_v0 = vld [vmem:[%s7472_s2] sm:$0xff] }
  0x44   :  { %3085 = vmatprep.subr.bf16.mxu0 %v5259_v1  ;;  %2881 = vmatpush1.bf16.msra.mxu1 %v5254_v6  ;;  %v106_v2 = vrot.slane %v73_v0, %v105_v60  ;;  %v6264_v6 = vsub.s32 4, %v6246_v55 }
  0x45   :  { %2882 = vmatprep.subr.bf16.mxu1 %v5262_v7 }
  0x47   :  { %3086 = vmatpush1.bf16.msra.mxu0 %v5257_v4  ;;  %v110_v4 = vrot.slane %v73_v0, %v109_v62  ;;  %v5338_v0 = vld [vmem:[%s7473_s3 + $0x260] ss:$16 sps:$4 sm:$0xff]  }
  0x48   :  { %3087 = vmatprep.subr.bf16.mxu0 %v5265_v5  ;;  %2883 = vmatpush1.bf16.msra.mxu1 %v5260_v10  ;;  %v6272_v10 = vld [vmem:[%s7472_s2 + $0x8] sm:$0xff] }
  0x49   :  { %2884 = vmatprep.subr.bf16.mxu1 %v5268_v11 }
  0x4b   :  { %3088 = vmatpush1.bf16.msra.mxu0 %v5263_v8 }
  0x4c   :  { %3089 = vmatprep.subr.bf16.mxu0 %v5271_v9  ;;  %2885 = vmatpush1.bf16.msra.mxu1 %v5266_v13  ;;  %v6267_v9 = vsub.s32 5, %v6246_v55  ;;  %v130_v13 = vrot.slane %v6272_v10, %v6264_v6 }
  0x4d   :  { %2886 = vmatprep.subr.bf16.mxu1 %v5274_v14 }
  0x4f   :  { %3090 = vmatpush1.bf16.msra.mxu0 %v5269_v12 }
  0x50   :  { %3091 = vmatprep.subr.bf16.mxu0 %v5277_v15  ;;  %2887 = vmatpush1.bf16.msra.mxu1 %v5272_v16  ;;  %v134_v16 = vrot.slane %v6272_v10, %v6267_v9 }
  0x51   :  { %2888 = vmatprep.subr.bf16.mxu1 %v5280_v18 }
  0x53   :  { %3092 = vmatpush1.bf16.msra.mxu0 %v5275_v17 }
  0x54   :  { %3093 = vmatprep.subr.bf16.mxu0 %v5283_v19  ;;  %2889 = vmatpush1.bf16.msra.mxu1 %v5278_v20 }
  0x55   :  { %2890 = vmatprep.subr.bf16.mxu1 %v5286_v22 }
  0x57   :  { %3094 = vmatpush1.bf16.msra.mxu0 %v5281_v21 }
  0x58   :  { %3095 = vmatprep.subr.bf16.mxu0 %v5289_v23  ;;  %2891 = vmatpush1.bf16.msra.mxu1 %v5284_v24 }
  0x59   :  { %2892 = vmatprep.subr.bf16.mxu1 %v5292_v26 }
  0x5b   :  { %3096 = vmatpush1.bf16.msra.mxu0 %v5287_v25 }
  0x5c   :  { %3097 = vmatprep.subr.bf16.mxu0 %v5295_v27  ;;  %2893 = vmatpush1.bf16.msra.mxu1 %v5290_v28  ;;  %v5320_v27 = vld [vmem:[%s7473_s3 + $0x200] ss:$16 sps:$4 sm:$0xff]   ;;  %v5323_v28 = vld [vmem:[%s7473_s3 + $0x208] ss:$16 sps:$4 sm:$0xff]  }
  0x5d   :  { %2894 = vmatprep.subr.bf16.mxu1 %v5298_v30 }
  0x5f   :  { %3098 = vmatpush1.bf16.msra.mxu0 %v5293_v29 }
  0x60   :  { %3099 = vmatprep.subr.bf16.mxu0 %v5301_v31  ;;  %2895 = vmatpush1.bf16.msra.mxu1 %v5296_v32 }
  0x61   :  { %2896 = vmatprep.subr.bf16.mxu1 %v5304_v34  ;;  %v5328_v34 = vld [vmem:[%s7473_s3 + $0x224] ss:$16 sps:$4 sm:$0xff]  }
  0x63   :  { %3100 = vmatpush1.bf16.msra.mxu0 %v5299_v33 }
  0x64   :  { %3101 = vmatprep.subr.bf16.mxu0 %v5307_v35  ;;  %2897 = vmatpush1.bf16.msra.mxu1 %v5302_v36  ;;  %v5331_v35 = vld [vmem:[%s7473_s3 + $0x22c] ss:$16 sps:$4 sm:$0xff]  }
  0x65   :  { %2898 = vmatprep.subr.bf16.mxu1 %v5310_v38 }
  0x67   :  { %3102 = vmatpush1.bf16.msra.mxu0 %v5305_v37  ;;  %v142_v37 = vrot.slane %v6272_v10, %v109_v62 }
  0x68   :  { %3103 = vmatprep.subr.bf16.mxu0 %v5313_v39  ;;  %2899 = vmatpush1.bf16.msra.mxu1 %v5308_v40  ;;  %v5326_v39 = vld [vmem:[%s7473_s3 + $0x220] ss:$16 sps:$4 sm:$0xff]   ;;  %v5329_v40 = vld [vmem:[%s7473_s3 + $0x228] ss:$16 sps:$4 sm:$0xff]  }
  0x69   :  { %2900 = vmatprep.subr.bf16.mxu1 %v5316_v42  ;;  %v5334_v42 = vld [vmem:[%s7473_s3 + $0x244] ss:$16 sps:$4 sm:$0xff]  }
  0x6b   :  { %3104 = vmatpush1.bf16.msra.mxu0 %v5311_v41 }
  0x6c   :  { %3105 = vmatprep.subr.bf16.mxu0 %v5319_v43  ;;  %2901 = vmatpush1.bf16.msra.mxu1 %v5314_v44  ;;  %v5337_v43 = vld [vmem:[%s7473_s3 + $0x24c] ss:$16 sps:$4 sm:$0xff]  }
  0x6d   :  { %2911 = vmatprep.subr.bf16.mxu1 %v5322_v46 }
  0x6f   :  { %3106 = vmatpush1.bf16.msra.mxu0 %v5317_v45 }
  0x70   :  { %3116 = vmatprep.subr.bf16.mxu0 %v5325_v47 }
  0xdd   :  { %v6238_v48 = vpop.f32.mrb[0].mxu0 }
  0xde   :  { %v6240_v49 = vpop.f32.mrb[1].mxu0 }
  0xdf   :  { %v451_v50 = vpop.f32.mrb[2].mxu0 }
  0xe0   :  { %v452_v51 = vpop.f32.mrb[3].mxu0 }
  0xe1   :  { %v5332_v51 = vld [vmem:[%s7473_s3 + $0x240] ss:$16 sps:$4 sm:$0xff]  }
  0xe2   :  { %v6248_v58 = vpop.f32.mrb[0].mxu1 }
  0xe3   :  { %v6250_v59 = vpop.f32.mrb[1].mxu1 }
  0xe4   :  { %v492_v61 = vpop.f32.mrb[2].mxu1 }
  0xe5   :  { %v6242_v53 = vpop.f32.mrb[4].mxu0  ;;  %v493_v63 = vpop.f32.mrb[3].mxu1  ;;  %v5343_v61 = vld [vmem:[%s7473_s3 + $0x26c] ss:$16 sps:$4 sm:$0xff]  }
  0xe6   :  { %v6244_v54 = vpop.f32.mrb[5].mxu0 }
  0xe7   :  { %v533_v56 = vpop.f32.mrb[6].mxu0 }
  0xe8   :  { %v534_v57 = vpop.f32.mrb[7].mxu0 }
  0xe9   :  { %v5340_v57 = vld [vmem:[%s7473_s3 + $0x264] ss:$16 sps:$4 sm:$0xff]  }
  0xea   :  { %v570_v8 = vpop.f32.mrb[4].mxu1 }
  0xeb   :  { %v6274_v11 = vadd.f32 %v570_v8, %v106_v2  ;;  %v572_v12 = vpop.f32.mrb[5].mxu1  ;;  %v5341_v2 = vld [vmem:[%s7473_s3 + $0x268] ss:$16 sps:$4 sm:$0xff]  }
  0xec   :  { %v6278_v14 = vadd.f32 %v572_v12, %v110_v4  ;;  %v574_v15 = vpop.f32.mrb[6].mxu1  ;;  %v5346_v4 = vld [vmem:[%s7473_s3 + $0x284] ss:$16 sps:$4 sm:$0xff]   ;;  %v5347_v8 = vld [vmem:[%s7473_s3 + $0x288] ss:$16 sps:$4 sm:$0xff]  }
  0xed   :  { %v6257_v1 = vpop.f32.mrb[8].mxu0  ;;  %v575_v17 = vpop.f32.mrb[7].mxu1  ;;  %v5352_v12 = vld [vmem:[%s7473_s3 + $0x2a4] ss:$16 sps:$4 sm:$0xff]   ;;  %v6354_v15 = vsub.s32 2, %v6246_v55 }
  0xee   :  { %v6261_v3 = vpop.f32.mrb[9].mxu0  ;;  %v6362_v17 = vld [vmem:[%s7472_s2 + $0x10] sm:$0x3f] }
  0xef   :  { %v615_v5 = vpop.f32.mrb[10].mxu0 }
  0xf0   :  { %v616_v7 = vpop.f32.mrb[11].mxu0  ;;  %v5349_v5 = vld [vmem:[%s7473_s3 + $0x28c] ss:$16 sps:$4 sm:$0xff]  }
  0xf1   :  { %v5344_v7 = vld [vmem:[%s7473_s3 + $0x280] ss:$16 sps:$4 sm:$0xff]  }
  0xf2   :  { %v6282_v25 = vpop.f32.mrb[8].mxu1 }
  0xf3   :  { %v6290_v29 = vpop.f32.mrb[9].mxu1 }
  0xf4   :  { %v656_v30 = vpop.f32.mrb[10].mxu1 }
  0xf5   :  { %v693_v18 = vpop.f32.mrb[12].mxu0  ;;  %v657_v32 = vpop.f32.mrb[11].mxu1  ;;  %v166_v30 = vrot.slane %v6362_v17, %v6267_v9 }
  0xf6   :  { %v694_v19 = vadd.f32 %v693_v18, %v130_v13  ;;  %v695_v20 = vpop.f32.mrb[13].mxu0  ;;  %v5355_v13 = vld [vmem:[%s7473_s3 + $0x2ac] ss:$16 sps:$4 sm:$0xff]   ;;  %v5350_v18 = vld [vmem:[%s7473_s3 + $0x2a0] ss:$16 sps:$4 sm:$0xff]  }
  0xf7   :  { %v696_v21 = vadd.f32 %v695_v20, %v134_v16  ;;  %v697_v22 = vpop.f32.mrb[14].mxu0  ;;  %v6357_v16 = vsub.s32 3, %v6246_v55  ;;  %v154_v20 = vrot.slane %v6362_v17, %v6354_v15 }
  0xf8   :  { %v876_v23 = vmax.f32 %v694_v19, 0.0  ;;  %v698_v24 = vpop.f32.mrb[15].mxu0  ;;  %v5353_v19 = vld [vmem:[%s7473_s3 + $0x2a8] ss:$16 sps:$4 sm:$0xff]  }
  0xf9   :  { %v877_v26 = vmax.f32 %v696_v21, 0.0  ;;  %v158_v22 = vrot.slane %v6362_v17, %v6357_v16 }
  0xfa   :  { %v918_v33 = vpack.c.bf16 %v876_v23, %v876_v23  ;;  %v6315_v44 = vpop.f32.mrb[12].mxu1  ;;  %v162_v23 = vrot.slane %v6362_v17, %v6264_v6 }
  0xfb   :  { %v919_v31 = vpack.c.bf16 %v877_v26, %v877_v26  ;;  %v736_v46 = vpop.f32.mrb[13].mxu1  ;;  %v5358_v26 = vld [vmem:[%s7473_s3 + $0x2c4] ss:$16 sps:$4 sm:$0xff]  }
  0xfc   :  { %v737_v47 = vadd.f32 %v736_v46, %v142_v37  ;;  %v738_v50 = vpop.f32.mrb[14].mxu1  ;;  %v5367_v46 = vld [vmem:[%s7473_s3 + $0x2ec] ss:$16 sps:$4 sm:$0xff]  }
  0xfd   :  { %2902 = vmatprep.mubr.bf16.mxu1 %v919_v31  ;;  %3107 = vmatprep.mubr.bf16.mxu0 %v919_v31  ;;  %v6298_v36 = vpop.f32.mrb[16].mxu0  ;;  %v739_v56 = vpop.f32.mrb[15].mxu1  ;;  %v5365_v50 = vld [vmem:[%s7473_s3 + $0x2e8] ss:$16 sps:$4 sm:$0xff]  }
  0xfe   :  { %2903 = vmatmul.mubr.bf16.vlgmr.msra.gmra.mrb[20].mxu1 %v918_v33  ;;  %3108 = vmatmul.mubr.bf16.vlgmr.msra.gmra.mrb[24].mxu0 %v918_v33  ;;  %v6301_v38 = vpop.f32.mrb[17].mxu0  ;;  %v879_v62 = vmax.f32 %v737_v47, 0.0  ;;  %v5362_v47 = vld [vmem:[%s7473_s3 + $0x2e0] ss:$16 sps:$4 sm:$0xff]  }
  0xff   :  { %2912 = vmatpush1.bf16.msra.mxu1 %v5320_v27  ;;  %3117 = vmatpush1.bf16.msra.mxu0 %v5323_v28  ;;  %v779_v41 = vpop.f32.mrb[18].mxu0  ;;  %v5361_v27 = vld [vmem:[%s7473_s3 + $0x2cc] ss:$16 sps:$4 sm:$0xff]   ;;  %v5368_v56 = vld [vmem:[%s7473_s3 + $0x300] ss:$16 sps:$4 sm:$0xff]  }
 0x100   :  { %2913 = vmatprep.subr.bf16.mxu1 %v5328_v34  ;;  %3118 = vmatprep.subr.bf16.mxu0 %v5331_v35  ;;  %v780_v45 = vpop.f32.mrb[19].mxu0  ;;  %v921_v63 = vpack.c.bf16 %v879_v62, %v879_v62  ;;  %v5379_v62 = vld [vmem:[%s7473_s3 + $0x32c] ss:$16 sps:$4 sm:$0xff]  }
 0x101   :  { %v5364_v45 = vld [vmem:[%s7473_s3 + $0x2e4] ss:$16 sps:$4 sm:$0xff]  }
 0x102   :  { %2943 = vmatprep.mubr.bf16.mxu1 %v921_v63  ;;  %3148 = vmatprep.mubr.bf16.mxu0 %v921_v63  ;;  %v816_v21 = vpop.f32.mrb[16].mxu1  ;;  %v5374_v63 = vld [vmem:[%s7473_s3 + $0x320] ss:$16 sps:$4 sm:$0xff]  }
 0x103   :  { %2914 = vmatpush1.bf16.msra.mxu1 %v5326_v39  ;;  %3119 = vmatpush1.bf16.msra.mxu0 %v5329_v40  ;;  %v818_v28 = vpop.f32.mrb[17].mxu1  ;;  %v6384_v32 = vadd.f32 %v816_v21, %v154_v20  ;;  %v5397_v20 = vld [vmem:[%s7473_s3 + $0x38c] ss:$16 sps:$4 sm:$0xff]  }
 0x104   :  { %2915 = vmatprep.subr.bf16.mxu1 %v5334_v42  ;;  %3120 = vmatprep.subr.bf16.mxu0 %v5337_v43  ;;  %v6386_v33 = vadd.f32 %v818_v28, %v158_v22  ;;  %v820_v34 = vpop.f32.mrb[18].mxu1  ;;  %v5356_v42 = vld [vmem:[%s7473_s3 + $0x2c0] ss:$16 sps:$4 sm:$0xff]   ;;  %v5359_v43 = vld [vmem:[%s7473_s3 + $0x2c8] ss:$16 sps:$4 sm:$0xff]  }
 0x105   :  { %v857_v24 = vpop.f32.mrb[20].mxu0  ;;  %v821_v39 = vpop.f32.mrb[19].mxu1 }
 0x106   :  { %v859_v31 = vpop.f32.mrb[21].mxu0  ;;  %v6388_v35 = vadd.f32 %v857_v24, %v162_v23 }
 0x107   :  { %2916 = vmatpush1.bf16.msra.mxu1 %v5332_v51  ;;  %3121 = vmatpush1.bf16.msra.mxu0 %v5335_v52  ;;  %v861_v37 = vpop.f32.mrb[22].mxu0  ;;  %v6390_v40 = vadd.f32 %v859_v31, %v166_v30  ;;  %v5370_v51 = vld [vmem:[%s7473_s3 + $0x304] ss:$16 sps:$4 sm:$0xff]   ;;  %v5373_v52 = vld [vmem:[%s7473_s3 + $0x30c] ss:$16 sps:$4 sm:$0xff]  }
 0x108   :  { %2917 = vmatprep.subr.bf16.mxu1 %v5340_v57  ;;  %3122 = vmatprep.subr.bf16.mxu0 %v5343_v61  ;;  %v862_v41 = vpop.f32.mrb[23].mxu0  ;;  %v5371_v57 = vld [vmem:[%s7473_s3 + $0x308] ss:$16 sps:$4 sm:$0xff]   ;;  %v5376_v61 = vld [vmem:[%s7473_s3 + $0x324] ss:$16 sps:$4 sm:$0xff]  }
 0x10b   :  { %2918 = vmatpush1.bf16.msra.mxu1 %v5338_v0  ;;  %3123 = vmatpush1.bf16.msra.mxu0 %v5341_v2  ;;  %v5377_v0 = vld [vmem:[%s7473_s3 + $0x328] ss:$16 sps:$4 sm:$0xff]   ;;  %v5382_v2 = vld [vmem:[%s7473_s3 + $0x344] ss:$16 sps:$4 sm:$0xff]  }
 0x10c   :  { %2919 = vmatprep.subr.bf16.mxu1 %v5346_v4  ;;  %3124 = vmatprep.subr.bf16.mxu0 %v5349_v5  ;;  %v5385_v4 = vld [vmem:[%s7473_s3 + $0x34c] ss:$16 sps:$4 sm:$0xff]   ;;  %v5380_v5 = vld [vmem:[%s7473_s3 + $0x340] ss:$16 sps:$4 sm:$0xff]  }
 0x10f   :  { %2920 = vmatpush1.bf16.msra.mxu1 %v5344_v7  ;;  %3125 = vmatpush1.bf16.msra.mxu0 %v5347_v8  ;;  %v5383_v7 = vld [vmem:[%s7473_s3 + $0x348] ss:$16 sps:$4 sm:$0xff]   ;;  %v5388_v8 = vld [vmem:[%s7473_s3 + $0x364] ss:$16 sps:$4 sm:$0xff]  }
 0x110   :  { %2921 = vmatprep.subr.bf16.mxu1 %v5352_v12  ;;  %3126 = vmatprep.subr.bf16.mxu0 %v5355_v13  ;;  %v5391_v12 = vld [vmem:[%s7473_s3 + $0x36c] ss:$16 sps:$4 sm:$0xff]   ;;  %v5386_v13 = vld [vmem:[%s7473_s3 + $0x360] ss:$16 sps:$4 sm:$0xff]  }
 0x113   :  { %2922 = vmatpush1.bf16.msra.mxu1 %v5350_v18  ;;  %3127 = vmatpush1.bf16.msra.mxu0 %v5353_v19  ;;  %v5389_v18 = vld [vmem:[%s7473_s3 + $0x368] ss:$16 sps:$4 sm:$0xff]   ;;  %v5394_v19 = vld [vmem:[%s7473_s3 + $0x384] ss:$16 sps:$4 sm:$0xff]  }
 0x114   :  { %2923 = vmatprep.subr.bf16.mxu1 %v5358_v26  ;;  %3128 = vmatprep.subr.bf16.mxu0 %v5361_v27 }
 0x117   :  { %2924 = vmatpush1.bf16.msra.mxu1 %v5356_v42  ;;  %3129 = vmatpush1.bf16.msra.mxu0 %v5359_v43 }
 0x118   :  { %2925 = vmatprep.subr.bf16.mxu1 %v5364_v45  ;;  %3130 = vmatprep.subr.bf16.mxu0 %v5367_v46 }
 0x11b   :  { %2926 = vmatpush1.bf16.msra.mxu1 %v5362_v47  ;;  %3131 = vmatpush1.bf16.msra.mxu0 %v5365_v50 }
 0x11c   :  { %2927 = vmatprep.subr.bf16.mxu1 %v5370_v51  ;;  %3132 = vmatprep.subr.bf16.mxu0 %v5373_v52 }
 0x11f   :  { %2928 = vmatpush1.bf16.msra.mxu1 %v5368_v56  ;;  %3133 = vmatpush1.bf16.msra.mxu0 %v5371_v57 }
 0x120   :  { %2929 = vmatprep.subr.bf16.mxu1 %v5376_v61  ;;  %3134 = vmatprep.subr.bf16.mxu0 %v5379_v62 }
 0x123   :  { %2930 = vmatpush1.bf16.msra.mxu1 %v5374_v63  ;;  %3135 = vmatpush1.bf16.msra.mxu0 %v5377_v0 }
 0x124   :  { %2931 = vmatprep.subr.bf16.mxu1 %v5382_v2  ;;  %3136 = vmatprep.subr.bf16.mxu0 %v5385_v4 }
 0x127   :  { %2932 = vmatpush1.bf16.msra.mxu1 %v5380_v5  ;;  %3137 = vmatpush1.bf16.msra.mxu0 %v5383_v7 }
 0x128   :  { %2933 = vmatprep.subr.bf16.mxu1 %v5388_v8  ;;  %3138 = vmatprep.subr.bf16.mxu0 %v5391_v12 }
 0x129   :  { %12 = vsyncpa [#allocation5], 0  ;;  %v5392_v21 = vld [vmem:[%s7473_s3 + $0x380] ss:$16 sps:$4 sm:$0xff]   ;;  %v5395_v22 = vld [vmem:[%s7473_s3 + $0x388] ss:$16 sps:$4 sm:$0xff]   ;;  %v138_v26 = vrot.slane %v6272_v10, %v105_v60 }
 0x12a   :  { %v5400_v23 = vld [vmem:[%s7473_s3 + $0x3a4] ss:$16 sps:$4 sm:$0xff]   ;;  %v5403_v24 = vld [vmem:[%s7473_s3 + $0x3ac] ss:$16 sps:$4 sm:$0xff]   ;;  %v6480_v27 = vsub.s32 1, %v6246_v55  ;;  %s5827_s24 = smov [#allocation4]  }
 0x12b   :  { %2934 = vmatpush1.bf16.msra.mxu1 %v5386_v13  ;;  %3139 = vmatpush1.bf16.msra.mxu0 %v5389_v18  ;;  %v5398_v28 = vld [vmem:[%s7473_s3 + $0x3a0] ss:$16 sps:$4 sm:$0xff]   ;;  %v5401_v30 = vld [vmem:[%s7473_s3 + $0x3a8] ss:$16 sps:$4 sm:$0xff]   ;;  %v5406_v31 = vld [vmem:[%s7473_s3 + $0x3c4] ss:$16 sps:$4 sm:$0xff]   ;;  %v735_v34 = vadd.f32 %v6315_v44, %v138_v26 }
 0x12c   :  { %2935 = vmatprep.subr.bf16.mxu1 %v5394_v19  ;;  %3140 = vmatprep.subr.bf16.mxu0 %v5397_v20  ;;  %v5409_v60 = vld [vmem:[%s7473_s3 + $0x3cc] ss:$16 sps:$4 sm:$0xff]   ;;  %v150_v10 = vrot.slane %v6362_v17, %v6480_v27  ;;  %v5404_v37 = vld [vmem:[%s7473_s3 + $0x3c0] ss:$16 sps:$4 sm:$0xff]   ;;  %v5407_v39 = vld [vmem:[%s7473_s3 + $0x3c8] ss:$16 sps:$4 sm:$0xff]  }
 0x12d   :  { %v5412_v41 = vld [vmem:[%s7473_s3 + $0x3e4] ss:$16 sps:$4 sm:$0xff]   ;;  %v5415_v44 = vld [vmem:[%s7473_s3 + $0x3ec] ss:$16 sps:$4 sm:$0xff]   ;;  %v878_v43 = vmax.f32 %v735_v34, 0.0  ;;  %s4371_s25 = sshll.u32 %s5827_s24, 4  ;;  %s4372_s25 = int_to_ptr.vmem [resolvable:$true] %s4371_s25 }
 0x12e   :  { %v778_v42 = vadd.f32 %v6301_v38, %v150_v10  ;;  %v5410_v45 = vld [vmem:[%s7473_s3 + $0x3e0] ss:$16 sps:$4 sm:$0xff]   ;;  %v5413_v46 = vld [vmem:[%s7473_s3 + $0x3e8] ss:$16 sps:$4 sm:$0xff]   ;;  %v5418_v47 = vld [vmem:[%s7473_s3 + $0x404] ss:$16 sps:$4 sm:$0xff]   ;;  %p5807_p1 = scmp.lt.s32.totalorder %s4372_s25, %s4372_s25 }
 0x12f   :  { %2936 = vmatpush1.bf16.msra.mxu1 %v5392_v21  ;;  %3141 = vmatpush1.bf16.msra.mxu0 %v5395_v22  ;;  %v5421_v38 = vld [vmem:[%s7473_s3 + $0x40c] ss:$16 sps:$4 sm:$0xff]   ;;  %v920_v51 = vpack.c.bf16 %v878_v43, %v878_v43  ;;  %v5416_v52 = vld [vmem:[%s7473_s3 + $0x400] ss:$16 sps:$4 sm:$0xff]   ;;  %v5419_v56 = vld [vmem:[%s7473_s3 + $0x408] ss:$16 sps:$4 sm:$0xff]  }
 0x130   :  { %2937 = vmatprep.subr.bf16.mxu1 %v5400_v23  ;;  %3142 = vmatprep.subr.bf16.mxu0 %v5403_v24  ;;  %v881_v50 = vmax.f32 %v778_v42, 0.0  ;;  %v5424_v57 = vld [vmem:[%s7473_s3 + $0x424] ss:$16 sps:$4 sm:$0xff]   ;;  %v5427_v61 = vld [vmem:[%s7473_s3 + $0x42c] ss:$16 sps:$4 sm:$0xff]   ;;  %s5802_s26 = scalar_lea.vmem %s4372_s25, 384 }
 0x131   :  { %v5422_v63 = vld [vmem:[%s7473_s3 + $0x420] ss:$16 sps:$4 sm:$0xff]   ;;  %v5425_v0 = vld [vmem:[%s7473_s3 + $0x428] ss:$16 sps:$4 sm:$0xff]   ;;  %v5430_v2 = vld [vmem:[%s7473_s3 + $0x444] ss:$16 sps:$4 sm:$0xff]   ;;  %p5803_p0 = scmp.ne.s32.totalorder %s4372_s25, %s5802_s26  ;;  %p5808_p2 = scmp.lt.s32.totalorder %s5802_s26, %s5802_s26 }
 0x132   :  { %v923_v62 = vpack.c.bf16 %v881_v50, %v881_v50  ;;  %v5433_v4 = vld [vmem:[%s7473_s3 + $0x44c] ss:$16 sps:$4 sm:$0xff]   ;;  %v5428_v5 = vld [vmem:[%s7473_s3 + $0x440] ss:$16 sps:$4 sm:$0xff]   ;;  %v5431_v7 = vld [vmem:[%s7473_s3 + $0x448] ss:$16 sps:$4 sm:$0xff]  }
 0x133   :  { %2938 = vmatpush1.bf16.msra.mxu1 %v5398_v28  ;;  %3143 = vmatpush1.bf16.msra.mxu0 %v5401_v30  ;;  %v5436_v8 = vld [vmem:[%s7473_s3 + $0x464] ss:$16 sps:$4 sm:$0xff]   ;;  %v5439_v12 = vld [vmem:[%s7473_s3 + $0x46c] ss:$16 sps:$4 sm:$0xff]   ;;  %v5434_v13 = vld [vmem:[%s7473_s3 + $0x460] ss:$16 sps:$4 sm:$0xff]   ;;  %p5809_p3 = por %p5808_p2, %p5807_p1 }
 0x134   :  { %2939 = vmatprep.subr.bf16.mxu1 %v5406_v31  ;;  %3144 = vmatprep.subr.bf16.mxu0 %v5409_v60  ;;  %v5437_v18 = vld [vmem:[%s7473_s3 + $0x468] ss:$16 sps:$4 sm:$0xff]   ;;  %v5442_v19 = vld [vmem:[%s7473_s3 + $0x484] ss:$16 sps:$4 sm:$0xff]   ;;  %v5445_v20 = vld [vmem:[%s7473_s3 + $0x48c] ss:$16 sps:$4 sm:$0xff]  }
 0x135   :  { %v5440_v21 = vld [vmem:[%s7473_s3 + $0x480] ss:$16 sps:$4 sm:$0xff]   ;;  %v5443_v22 = vld [vmem:[%s7473_s3 + $0x488] ss:$16 sps:$4 sm:$0xff]   ;;  %v5448_v23 = vld [vmem:[%s7473_s3 + $0x4a4] ss:$16 sps:$4 sm:$0xff]   ;;  %p5810_p4 = pnand %p5809_p3, %p5803_p0 }
 0x136   :  { %v5451_v24 = vld [vmem:[%s7473_s3 + $0x4ac] ss:$16 sps:$4 sm:$0xff]   ;;  %v5446_v26 = vld [vmem:[%s7473_s3 + $0x4a0] ss:$16 sps:$4 sm:$0xff]   ;;  %v5449_v28 = vld [vmem:[%s7473_s3 + $0x4a8] ss:$16 sps:$4 sm:$0xff]  }
 0x137   :  { %2940 = vmatpush1.bf16.msra.mxu1 %v5404_v37  ;;  %3145 = vmatpush1.bf16.msra.mxu0 %v5407_v39  ;;  %v5454_v30 = vld [vmem:[%s7473_s3 + $0x4c4] ss:$16 sps:$4 sm:$0xff]   ;;  %v5457_v31 = vld [vmem:[%s7473_s3 + $0x4cc] ss:$16 sps:$4 sm:$0xff]   ;;  %v5452_v60 = vld [vmem:[%s7473_s3 + $0x4c0] ss:$16 sps:$4 sm:$0xff]  }
 0x138   :  { %2941 = vmatprep.subr.bf16.mxu1 %v5412_v41  ;;  %3146 = vmatprep.subr.bf16.mxu0 %v5415_v44  ;;  %v5455_v10 = vld [vmem:[%s7473_s3 + $0x4c8] ss:$16 sps:$4 sm:$0xff]   ;;  %v5460_v34 = vld [vmem:[%s7473_s3 + $0x4e4] ss:$16 sps:$4 sm:$0xff]   ;;  %v5463_v37 = vld [vmem:[%s7473_s3 + $0x4ec] ss:$16 sps:$4 sm:$0xff]  }
 0x139   :  { %v5458_v39 = vld [vmem:[%s7473_s3 + $0x4e0] ss:$16 sps:$4 sm:$0xff]   ;;  %v5461_v41 = vld [vmem:[%s7473_s3 + $0x4e8] ss:$16 sps:$4 sm:$0xff]   ;;  %v5466_v44 = vld [vmem:[%s7473_s3 + $0x504] ss:$16 sps:$4 sm:$0xff]  }
 0x13a   :  { %v5469_v42 = vld [vmem:[%s7473_s3 + $0x50c] ss:$16 sps:$4 sm:$0xff]   ;;  %v5464_v43 = vld [vmem:[%s7473_s3 + $0x500] ss:$16 sps:$4 sm:$0xff]   ;;  %v5473_v50 = vld [vmem:[%s7473_s3 + $0x528] ss:$16 sps:$4 sm:$0xff]  }
 0x13b   :  { %2942 = vmatpush1.bf16.msra.mxu1 %v5410_v45  ;;  %3147 = vmatpush1.bf16.msra.mxu0 %v5413_v46  ;;  %v5467_v45 = vld [vmem:[%s7473_s3 + $0x508] ss:$16 sps:$4 sm:$0xff]   ;;  %v5472_v46 = vld [vmem:[%s7473_s3 + $0x524] ss:$16 sps:$4 sm:$0xff]  }
 0x13c   :  { %2952 = vmatprep.subr.bf16.mxu1 %v5418_v47  ;;  %3157 = vmatprep.subr.bf16.mxu0 %v5421_v38  ;;  %v5475_v47 = vld [vmem:[%s7473_s3 + $0x52c] ss:$16 sps:$4 sm:$0xff]   ;;  %v5470_v38 = vld [vmem:[%s7473_s3 + $0x520] ss:$16 sps:$4 sm:$0xff]  }
 0x13e   :  { %2944 = vmatmul.mubr.bf16.vlgmr.msra.gmra.mrb[20].mxu1 %v920_v51  ;;  %3149 = vmatmul.mubr.bf16.vlgmr.msra.gmra.mrb[24].mxu0 %v920_v51  ;;  %v5478_v51 = vld [vmem:[%s7473_s3 + $0x544] ss:$16 sps:$4 sm:$0xff]  }
 0x13f   :  { %2953 = vmatpush1.bf16.msra.mxu1 %v5416_v52  ;;  %3158 = vmatpush1.bf16.msra.mxu0 %v5419_v56  ;;  %v5481_v52 = vld [vmem:[%s7473_s3 + $0x54c] ss:$16 sps:$4 sm:$0xff]   ;;  %v5476_v56 = vld [vmem:[%s7473_s3 + $0x540] ss:$16 sps:$4 sm:$0xff]  }
 0x140   :  { %2954 = vmatprep.subr.bf16.mxu1 %v5424_v57  ;;  %3159 = vmatprep.subr.bf16.mxu0 %v5427_v61  ;;  %v5479_v57 = vld [vmem:[%s7473_s3 + $0x548] ss:$16 sps:$4 sm:$0xff]   ;;  %v5484_v61 = vld [vmem:[%s7473_s3 + $0x564] ss:$16 sps:$4 sm:$0xff]  }
 0x141   :  { %2984 = vmatprep.mubr.bf16.mxu1 %v923_v62  ;;  %3189 = vmatprep.mubr.bf16.mxu0 %v923_v62  ;;  %v5487_v62 = vld [vmem:[%s7473_s3 + $0x56c] ss:$16 sps:$4 sm:$0xff]  }
 0x143   :  { %2955 = vmatpush1.bf16.msra.mxu1 %v5422_v63  ;;  %3160 = vmatpush1.bf16.msra.mxu0 %v5425_v0  ;;  %v5482_v63 = vld [vmem:[%s7473_s3 + $0x560] ss:$16 sps:$4 sm:$0xff]   ;;  %v5485_v0 = vld [vmem:[%s7473_s3 + $0x568] ss:$16 sps:$4 sm:$0xff]  }
 0x144   :  { %2956 = vmatprep.subr.bf16.mxu1 %v5430_v2  ;;  %3161 = vmatprep.subr.bf16.mxu0 %v5433_v4  ;;  %v5490_v2 = vld [vmem:[%s7473_s3 + $0x584] ss:$16 sps:$4 sm:$0xff]   ;;  %v5493_v4 = vld [vmem:[%s7473_s3 + $0x58c] ss:$16 sps:$4 sm:$0xff]  }
 0x147   :  { %2957 = vmatpush1.bf16.msra.mxu1 %v5428_v5  ;;  %3162 = vmatpush1.bf16.msra.mxu0 %v5431_v7  ;;  %v5488_v5 = vld [vmem:[%s7473_s3 + $0x580] ss:$16 sps:$4 sm:$0xff]   ;;  %v5491_v7 = vld [vmem:[%s7473_s3 + $0x588] ss:$16 sps:$4 sm:$0xff]  }
 0x148   :  { %2958 = vmatprep.subr.bf16.mxu1 %v5436_v8  ;;  %3163 = vmatprep.subr.bf16.mxu0 %v5439_v12  ;;  %v6673_v8 = vsub.s32 0, %v6246_v55  ;;  %v5496_v12 = vld [vmem:[%s7473_s3 + $0x5a4] ss:$16 sps:$4 sm:$0xff]   ;;  %v5494_v55 = vld [vmem:[%s7473_s3 + $0x5a0] ss:$16 sps:$4 sm:$0xff]  }
 0x14b   :  { %2959 = vmatpush1.bf16.msra.mxu1 %v5434_v13  ;;  %3164 = vmatpush1.bf16.msra.mxu0 %v5437_v18  ;;  %v5499_v13 = vld [vmem:[%s7473_s3 + $0x5ac] ss:$16 sps:$4 sm:$0xff]   ;;  %v146_v18 = vrot.slane %v6362_v17, %v6673_v8 }
 0x14c   :  { %2960 = vmatprep.subr.bf16.mxu1 %v5442_v19  ;;  %3165 = vmatprep.subr.bf16.mxu0 %v5445_v20  ;;  %v5497_v19 = vld [vmem:[%s7473_s3 + $0x5a8] ss:$16 sps:$4 sm:$0xff]   ;;  %v5502_v20 = vld [vmem:[%s7473_s3 + $0x5c4] ss:$16 sps:$4 sm:$0xff]   ;;  %v5505_v17 = vld [vmem:[%s7473_s3 + $0x5cc] ss:$16 sps:$4 sm:$0xff]  }
 0x14f   :  { %2961 = vmatpush1.bf16.msra.mxu1 %v5440_v21  ;;  %3166 = vmatpush1.bf16.msra.mxu0 %v5443_v22  ;;  %v776_v21 = vadd.f32 %v6298_v36, %v146_v18  ;;  %v5500_v22 = vld [vmem:[%s7473_s3 + $0x5c0] ss:$16 sps:$4 sm:$0xff]   ;;  %v5511_v36 = vld [vmem:[%s7473_s3 + $0x5ec] ss:$16 sps:$4 sm:$0xff]   ;;  %v5551_v18 = vld [vmem:[%s7473_s3 + $0x6c8] ss:$16 sps:$4 sm:$0xff]  }
 0x150   :  { %2962 = vmatprep.subr.bf16.mxu1 %v5448_v23  ;;  %3167 = vmatprep.subr.bf16.mxu0 %v5451_v24  ;;  %v5503_v23 = vld [vmem:[%s7473_s3 + $0x5c8] ss:$16 sps:$4 sm:$0xff]   ;;  %v5508_v24 = vld [vmem:[%s7473_s3 + $0x5e4] ss:$16 sps:$4 sm:$0xff]  }
 0x153   :  { %2963 = vmatpush1.bf16.msra.mxu1 %v5446_v26  ;;  %3168 = vmatpush1.bf16.msra.mxu0 %v5449_v28  ;;  %v880_v26 = vmax.f32 %v776_v21, 0.0  ;;  %v5506_v28 = vld [vmem:[%s7473_s3 + $0x5e0] ss:$16 sps:$4 sm:$0xff]   ;;  %v5562_v21 = vld [vmem:[%s7473_s3 + $0x704] ss:$16 sps:$4 sm:$0xff]  }
 0x154   :  { %2964 = vmatprep.subr.bf16.mxu1 %v5454_v30  ;;  %3169 = vmatprep.subr.bf16.mxu0 %v5457_v31  ;;  %v5509_v30 = vld [vmem:[%s7473_s3 + $0x5e8] ss:$16 sps:$4 sm:$0xff]   ;;  %v5514_v31 = vld [vmem:[%s7473_s3 + $0x604] ss:$16 sps:$4 sm:$0xff]  }
 0x157   :  { %2965 = vmatpush1.bf16.msra.mxu1 %v5452_v60  ;;  %3170 = vmatpush1.bf16.msra.mxu0 %v5455_v10  ;;  %v5517_v60 = vld [vmem:[%s7473_s3 + $0x60c] ss:$16 sps:$4 sm:$0xff]   ;;  %v883_v10 = vmax.f32 %v6386_v33, 0.0 }
 0x158   :  { %2966 = vmatprep.subr.bf16.mxu1 %v5460_v34  ;;  %3171 = vmatprep.subr.bf16.mxu0 %v5463_v37  ;;  %v922_v34 = vpack.c.bf16 %v880_v26, %v880_v26  ;;  %v5512_v37 = vld [vmem:[%s7473_s3 + $0x600] ss:$16 sps:$4 sm:$0xff]   ;;  %v5523_v33 = vld [vmem:[%s7473_s3 + $0x62c] ss:$16 sps:$4 sm:$0xff]  }
 0x159   :  { %v5571_v26 = vld [vmem:[%s7473_s3 + $0x72c] ss:$16 sps:$4 sm:$0xff]  }
 0x15b   :  { %2967 = vmatpush1.bf16.msra.mxu1 %v5458_v39  ;;  %3172 = vmatpush1.bf16.msra.mxu0 %v5461_v41  ;;  %v5515_v39 = vld [vmem:[%s7473_s3 + $0x608] ss:$16 sps:$4 sm:$0xff]   ;;  %v5520_v41 = vld [vmem:[%s7473_s3 + $0x624] ss:$16 sps:$4 sm:$0xff]  }
 0x15c   :  { %2968 = vmatprep.subr.bf16.mxu1 %v5466_v44  ;;  %3173 = vmatprep.subr.bf16.mxu0 %v5469_v42  ;;  %v925_v44 = vpack.c.bf16 %v883_v10, %v883_v10  ;;  %v5518_v42 = vld [vmem:[%s7473_s3 + $0x620] ss:$16 sps:$4 sm:$0xff]  }
 0x15d   :  { %v5572_v10 = vld [vmem:[%s7473_s3 + $0x740] ss:$16 sps:$4 sm:$0xff]  }
 0x15f   :  { %2969 = vmatpush1.bf16.msra.mxu1 %v5464_v43  ;;  %3174 = vmatpush1.bf16.msra.mxu0 %v5467_v45  ;;  %v5521_v43 = vld [vmem:[%s7473_s3 + $0x628] ss:$16 sps:$4 sm:$0xff]   ;;  %v5526_v45 = vld [vmem:[%s7473_s3 + $0x644] ss:$16 sps:$4 sm:$0xff]  }
 0x160   :  { %2970 = vmatprep.subr.bf16.mxu1 %v5472_v46  ;;  %3175 = vmatprep.subr.bf16.mxu0 %v5475_v47  ;;  %v5529_v46 = vld [vmem:[%s7473_s3 + $0x64c] ss:$16 sps:$4 sm:$0xff]   ;;  %v5524_v47 = vld [vmem:[%s7473_s3 + $0x640] ss:$16 sps:$4 sm:$0xff]  }
 0x163   :  { %2971 = vmatpush1.bf16.msra.mxu1 %v5470_v38  ;;  %3176 = vmatpush1.bf16.msra.mxu0 %v5473_v50  ;;  %v5527_v38 = vld [vmem:[%s7473_s3 + $0x648] ss:$16 sps:$4 sm:$0xff]   ;;  %v5532_v50 = vld [vmem:[%s7473_s3 + $0x664] ss:$16 sps:$4 sm:$0xff]  }
 0x164   :  { %2972 = vmatprep.subr.bf16.mxu1 %v5478_v51  ;;  %3177 = vmatprep.subr.bf16.mxu0 %v5481_v52  ;;  %v5535_v51 = vld [vmem:[%s7473_s3 + $0x66c] ss:$16 sps:$4 sm:$0xff]   ;;  %v5530_v52 = vld [vmem:[%s7473_s3 + $0x660] ss:$16 sps:$4 sm:$0xff]  }
 0x167   :  { %2973 = vmatpush1.bf16.msra.mxu1 %v5476_v56  ;;  %3178 = vmatpush1.bf16.msra.mxu0 %v5479_v57  ;;  %v5533_v56 = vld [vmem:[%s7473_s3 + $0x668] ss:$16 sps:$4 sm:$0xff]   ;;  %v5538_v57 = vld [vmem:[%s7473_s3 + $0x684] ss:$16 sps:$4 sm:$0xff]  }
 0x168   :  { %2974 = vmatprep.subr.bf16.mxu1 %v5484_v61  ;;  %3179 = vmatprep.subr.bf16.mxu0 %v5487_v62  ;;  %v5541_v61 = vld [vmem:[%s7473_s3 + $0x68c] ss:$16 sps:$4 sm:$0xff]   ;;  %v5536_v62 = vld [vmem:[%s7473_s3 + $0x680] ss:$16 sps:$4 sm:$0xff]  }
 0x16b   :  { %2975 = vmatpush1.bf16.msra.mxu1 %v5482_v63  ;;  %3180 = vmatpush1.bf16.msra.mxu0 %v5485_v0  ;;  %v5539_v63 = vld [vmem:[%s7473_s3 + $0x688] ss:$16 sps:$4 sm:$0xff]   ;;  %v5544_v0 = vld [vmem:[%s7473_s3 + $0x6a4] ss:$16 sps:$4 sm:$0xff]  }
 0x16c   :  { %2976 = vmatprep.subr.bf16.mxu1 %v5490_v2  ;;  %3181 = vmatprep.subr.bf16.mxu0 %v5493_v4  ;;  %v5547_v2 = vld [vmem:[%s7473_s3 + $0x6ac] ss:$16 sps:$4 sm:$0xff]   ;;  %v5542_v4 = vld [vmem:[%s7473_s3 + $0x6a0] ss:$16 sps:$4 sm:$0xff]  }
 0x16f   :  { %2977 = vmatpush1.bf16.msra.mxu1 %v5488_v5  ;;  %3182 = vmatpush1.bf16.msra.mxu0 %v5491_v7  ;;  %v5545_v5 = vld [vmem:[%s7473_s3 + $0x6a8] ss:$16 sps:$4 sm:$0xff]   ;;  %v5550_v7 = vld [vmem:[%s7473_s3 + $0x6c4] ss:$16 sps:$4 sm:$0xff]  }
 0x170   :  { %2978 = vmatprep.subr.bf16.mxu1 %v5496_v12  ;;  %3183 = vmatprep.subr.bf16.mxu0 %v5499_v13  ;;  %v5553_v12 = vld [vmem:[%s7473_s3 + $0x6cc] ss:$16 sps:$4 sm:$0xff]   ;;  %v5548_v13 = vld [vmem:[%s7473_s3 + $0x6c0] ss:$16 sps:$4 sm:$0xff]  }
 0x173   :  { %2979 = vmatpush1.bf16.msra.mxu1 %v5494_v55  ;;  %3184 = vmatpush1.bf16.msra.mxu0 %v5497_v19  ;;  %v5556_v55 = vld [vmem:[%s7473_s3 + $0x6e4] ss:$16 sps:$4 sm:$0xff]   ;;  %v5559_v19 = vld [vmem:[%s7473_s3 + $0x6ec] ss:$16 sps:$4 sm:$0xff]  }
 0x174   :  { %2980 = vmatprep.subr.bf16.mxu1 %v5502_v20  ;;  %3185 = vmatprep.subr.bf16.mxu0 %v5505_v17  ;;  %v5554_v20 = vld [vmem:[%s7473_s3 + $0x6e0] ss:$16 sps:$4 sm:$0xff]   ;;  %v5557_v17 = vld [vmem:[%s7473_s3 + $0x6e8] ss:$16 sps:$4 sm:$0xff]  }
 0x177   :  { %2981 = vmatpush1.bf16.msra.mxu1 %v5500_v22  ;;  %3186 = vmatpush1.bf16.msra.mxu0 %v5503_v23  ;;  %v5565_v22 = vld [vmem:[%s7473_s3 + $0x70c] ss:$16 sps:$4 sm:$0xff]   ;;  %v5560_v23 = vld [vmem:[%s7473_s3 + $0x700] ss:$16 sps:$4 sm:$0xff]  }
 0x178   :  { %2982 = vmatprep.subr.bf16.mxu1 %v5508_v24  ;;  %3187 = vmatprep.subr.bf16.mxu0 %v5511_v36  ;;  %v5563_v24 = vld [vmem:[%s7473_s3 + $0x708] ss:$16 sps:$4 sm:$0xff]   ;;  %v5568_v36 = vld [vmem:[%s7473_s3 + $0x724] ss:$16 sps:$4 sm:$0xff]  }
 0x17b   :  { %2983 = vmatpush1.bf16.msra.mxu1 %v5506_v28  ;;  %3188 = vmatpush1.bf16.msra.mxu0 %v5509_v30  ;;  %v5566_v28 = vld [vmem:[%s7473_s3 + $0x720] ss:$16 sps:$4 sm:$0xff]   ;;  %v5569_v30 = vld [vmem:[%s7473_s3 + $0x728] ss:$16 sps:$4 sm:$0xff]  }
 0x17c   :  { %2993 = vmatprep.subr.bf16.mxu1 %v5514_v31  ;;  %3198 = vmatprep.subr.bf16.mxu0 %v5517_v60  ;;  %v5574_v31 = vld [vmem:[%s7473_s3 + $0x744] ss:$16 sps:$4 sm:$0xff]   ;;  %v5577_v60 = vld [vmem:[%s7473_s3 + $0x74c] ss:$16 sps:$4 sm:$0xff]  }
 0x17e   :  { %2985 = vmatmul.mubr.bf16.vlgmr.msra.gmra.mrb[20].mxu1 %v922_v34  ;;  %3190 = vmatmul.mubr.bf16.vlgmr.msra.gmra.mrb[24].mxu0 %v922_v34  ;;  %v5575_v34 = vld [vmem:[%s7473_s3 + $0x748] ss:$16 sps:$4 sm:$0xff]  }
 0x17f   :  { %2994 = vmatpush1.bf16.msra.mxu1 %v5512_v37  ;;  %3199 = vmatpush1.bf16.msra.mxu0 %v5515_v39  ;;  %v5580_v37 = vld [vmem:[%s7473_s3 + $0x764] ss:$16 sps:$4 sm:$0xff]   ;;  %v5583_v39 = vld [vmem:[%s7473_s3 + $0x76c] ss:$16 sps:$4 sm:$0xff]  }
 0x180   :  { %2995 = vmatprep.subr.bf16.mxu1 %v5520_v41  ;;  %3200 = vmatprep.subr.bf16.mxu0 %v5523_v33  ;;  %v5578_v41 = vld [vmem:[%s7473_s3 + $0x760] ss:$16 sps:$4 sm:$0xff]   ;;  %v5581_v33 = vld [vmem:[%s7473_s3 + $0x768] ss:$16 sps:$4 sm:$0xff]  }
 0x181   :  { %3025 = vmatprep.mubr.bf16.mxu1 %v925_v44  ;;  %3230 = vmatprep.mubr.bf16.mxu0 %v925_v44  ;;  %v5586_v44 = vld [vmem:[%s7473_s3 + $0x784] ss:$16 sps:$4 sm:$0xff]  }
 0x183   :  { %2996 = vmatpush1.bf16.msra.mxu1 %v5518_v42  ;;  %3201 = vmatpush1.bf16.msra.mxu0 %v5521_v43  ;;  %v5589_v42 = vld [vmem:[%s7473_s3 + $0x78c] ss:$16 sps:$4 sm:$0xff]   ;;  %v5584_v43 = vld [vmem:[%s7473_s3 + $0x780] ss:$16 sps:$4 sm:$0xff]  }
 0x184   :  { %2997 = vmatprep.subr.bf16.mxu1 %v5526_v45  ;;  %3202 = vmatprep.subr.bf16.mxu0 %v5529_v46  ;;  %v5587_v45 = vld [vmem:[%s7473_s3 + $0x788] ss:$16 sps:$4 sm:$0xff]   ;;  %v5592_v46 = vld [vmem:[%s7473_s3 + $0x7a4] ss:$16 sps:$4 sm:$0xff]  }
 0x187   :  { %2998 = vmatpush1.bf16.msra.mxu1 %v5524_v47  ;;  %3203 = vmatpush1.bf16.msra.mxu0 %v5527_v38  ;;  %v5595_v47 = vld [vmem:[%s7473_s3 + $0x7ac] ss:$16 sps:$4 sm:$0xff]   ;;  %v5590_v38 = vld [vmem:[%s7473_s3 + $0x7a0] ss:$16 sps:$4 sm:$0xff]  }
 0x188   :  { %2999 = vmatprep.subr.bf16.mxu1 %v5532_v50  ;;  %3204 = vmatprep.subr.bf16.mxu0 %v5535_v51  ;;  %v5593_v50 = vld [vmem:[%s7473_s3 + $0x7a8] ss:$16 sps:$4 sm:$0xff]   ;;  %v5598_v51 = vld [vmem:[%s7473_s3 + $0x7c4] ss:$16 sps:$4 sm:$0xff]  }
 0x18b   :  { %3000 = vmatpush1.bf16.msra.mxu1 %v5530_v52  ;;  %3205 = vmatpush1.bf16.msra.mxu0 %v5533_v56  ;;  %v5601_v52 = vld [vmem:[%s7473_s3 + $0x7cc] ss:$16 sps:$4 sm:$0xff]   ;;  %v5596_v56 = vld [vmem:[%s7473_s3 + $0x7c0] ss:$16 sps:$4 sm:$0xff]  }
 0x18c   :  { %3001 = vmatprep.subr.bf16.mxu1 %v5538_v57  ;;  %3206 = vmatprep.subr.bf16.mxu0 %v5541_v61  ;;  %v5599_v57 = vld [vmem:[%s7473_s3 + $0x7c8] ss:$16 sps:$4 sm:$0xff]   ;;  %v5604_v61 = vld [vmem:[%s7473_s3 + $0x7e4] ss:$16 sps:$4 sm:$0xff]  }
 0x18f   :  { %3002 = vmatpush1.bf16.msra.mxu1 %v5536_v62  ;;  %3207 = vmatpush1.bf16.msra.mxu0 %v5539_v63  ;;  %v5607_v62 = vld [vmem:[%s7473_s3 + $0x7ec] ss:$16 sps:$4 sm:$0xff]   ;;  %v5602_v63 = vld [vmem:[%s7473_s3 + $0x7e0] ss:$16 sps:$4 sm:$0xff]  }
 0x190   :  { %3003 = vmatprep.subr.bf16.mxu1 %v5544_v0  ;;  %3208 = vmatprep.subr.bf16.mxu0 %v5547_v2  ;;  %v5605_v0 = vld [vmem:[%s7473_s3 + $0x7e8] ss:$16 sps:$4 sm:$0xff]   ;;  %v882_v2 = vmax.f32 %v6384_v32, 0.0 }
 0x191   :  { %v5611_v32 = vld [vmem:[%s7473_s3 + $0x808] ss:$16 sps:$4 sm:$0xff]  }
 0x193   :  { %3004 = vmatpush1.bf16.msra.mxu1 %v5542_v4  ;;  %3209 = vmatpush1.bf16.msra.mxu0 %v5545_v5  ;;  %v5610_v4 = vld [vmem:[%s7473_s3 + $0x804] ss:$16 sps:$4 sm:$0xff]   ;;  %v5613_v5 = vld [vmem:[%s7473_s3 + $0x80c] ss:$16 sps:$4 sm:$0xff]  }
 0x194   :  { %3005 = vmatprep.subr.bf16.mxu1 %v5550_v7  ;;  %3210 = vmatprep.subr.bf16.mxu0 %v5553_v12  ;;  %v885_v7 = vmax.f32 %v6390_v40, 0.0  ;;  %v5608_v12 = vld [vmem:[%s7473_s3 + $0x800] ss:$16 sps:$4 sm:$0xff]   ;;  %v5619_v40 = vld [vmem:[%s7473_s3 + $0x82c] ss:$16 sps:$4 sm:$0xff]  }
 0x197   :  { %3006 = vmatpush1.bf16.msra.mxu1 %v5548_v13  ;;  %3211 = vmatpush1.bf16.msra.mxu0 %v5551_v18  ;;  %v924_v13 = vpack.c.bf16 %v882_v2, %v882_v2  ;;  %v927_v18 = vpack.c.bf16 %v885_v7, %v885_v7  ;;  %v5673_v2 = vld [vmem:[%s7473_s3 + $0x94c] ss:$16 sps:$4 sm:$0xff]   ;;  %v5676_v7 = vld [vmem:[%s7473_s3 + $0x964] ss:$16 sps:$4 sm:$0xff]  }
 0x198   :  { %3007 = vmatprep.subr.bf16.mxu1 %v5556_v55  ;;  %3212 = vmatprep.subr.bf16.mxu0 %v5559_v19  ;;  %v5616_v55 = vld [vmem:[%s7473_s3 + $0x824] ss:$16 sps:$4 sm:$0xff]   ;;  %v5614_v19 = vld [vmem:[%s7473_s3 + $0x820] ss:$16 sps:$4 sm:$0xff]  }
 0x19b   :  { %3008 = vmatpush1.bf16.msra.mxu1 %v5554_v20  ;;  %3213 = vmatpush1.bf16.msra.mxu0 %v5557_v17  ;;  %v5617_v20 = vld [vmem:[%s7473_s3 + $0x828] ss:$16 sps:$4 sm:$0xff]   ;;  %v5622_v17 = vld [vmem:[%s7473_s3 + $0x844] ss:$16 sps:$4 sm:$0xff]  }
 0x19c   :  { %3009 = vmatprep.subr.bf16.mxu1 %v5562_v21  ;;  %3214 = vmatprep.subr.bf16.mxu0 %v5565_v22  ;;  %v5625_v21 = vld [vmem:[%s7473_s3 + $0x84c] ss:$16 sps:$4 sm:$0xff]   ;;  %v5620_v22 = vld [vmem:[%s7473_s3 + $0x840] ss:$16 sps:$4 sm:$0xff]  }
 0x19f   :  { %3010 = vmatpush1.bf16.msra.mxu1 %v5560_v23  ;;  %3215 = vmatpush1.bf16.msra.mxu0 %v5563_v24  ;;  %v5623_v23 = vld [vmem:[%s7473_s3 + $0x848] ss:$16 sps:$4 sm:$0xff]   ;;  %v5628_v24 = vld [vmem:[%s7473_s3 + $0x864] ss:$16 sps:$4 sm:$0xff]  }
 0x1a0   :  { %3011 = vmatprep.subr.bf16.mxu1 %v5568_v36  ;;  %3216 = vmatprep.subr.bf16.mxu0 %v5571_v26  ;;  %v5631_v36 = vld [vmem:[%s7473_s3 + $0x86c] ss:$16 sps:$4 sm:$0xff]   ;;  %v5626_v26 = vld [vmem:[%s7473_s3 + $0x860] ss:$16 sps:$4 sm:$0xff]  }
 0x1a3   :  { %3012 = vmatpush1.bf16.msra.mxu1 %v5566_v28  ;;  %3217 = vmatpush1.bf16.msra.mxu0 %v5569_v30  ;;  %v5629_v28 = vld [vmem:[%s7473_s3 + $0x868] ss:$16 sps:$4 sm:$0xff]   ;;  %v5634_v30 = vld [vmem:[%s7473_s3 + $0x884] ss:$16 sps:$4 sm:$0xff]  }
 0x1a4   :  { %3013 = vmatprep.subr.bf16.mxu1 %v5574_v31  ;;  %3218 = vmatprep.subr.bf16.mxu0 %v5577_v60  ;;  %v5637_v31 = vld [vmem:[%s7473_s3 + $0x88c] ss:$16 sps:$4 sm:$0xff]   ;;  %v5632_v60 = vld [vmem:[%s7473_s3 + $0x880] ss:$16 sps:$4 sm:$0xff]  }
 0x1a7   :  { %3014 = vmatpush1.bf16.msra.mxu1 %v5572_v10  ;;  %3219 = vmatpush1.bf16.msra.mxu0 %v5575_v34  ;;  %v5635_v10 = vld [vmem:[%s7473_s3 + $0x888] ss:$16 sps:$4 sm:$0xff]   ;;  %v5640_v34 = vld [vmem:[%s7473_s3 + $0x8a4] ss:$16 sps:$4 sm:$0xff]  }
 0x1a8   :  { %3015 = vmatprep.subr.bf16.mxu1 %v5580_v37  ;;  %3220 = vmatprep.subr.bf16.mxu0 %v5583_v39  ;;  %v5643_v37 = vld [vmem:[%s7473_s3 + $0x8ac] ss:$16 sps:$4 sm:$0xff]   ;;  %v5638_v39 = vld [vmem:[%s7473_s3 + $0x8a0] ss:$16 sps:$4 sm:$0xff]  }
 0x1ab   :  { %3016 = vmatpush1.bf16.msra.mxu1 %v5578_v41  ;;  %3221 = vmatpush1.bf16.msra.mxu0 %v5581_v33  ;;  %v5641_v41 = vld [vmem:[%s7473_s3 + $0x8a8] ss:$16 sps:$4 sm:$0xff]   ;;  %v5646_v33 = vld [vmem:[%s7473_s3 + $0x8c4] ss:$16 sps:$4 sm:$0xff]  }
 0x1ac   :  { %3017 = vmatprep.subr.bf16.mxu1 %v5586_v44  ;;  %3222 = vmatprep.subr.bf16.mxu0 %v5589_v42  ;;  %v5649_v44 = vld [vmem:[%s7473_s3 + $0x8cc] ss:$16 sps:$4 sm:$0xff]   ;;  %v5644_v42 = vld [vmem:[%s7473_s3 + $0x8c0] ss:$16 sps:$4 sm:$0xff]  }
 0x1af   :  { %3018 = vmatpush1.bf16.msra.mxu1 %v5584_v43  ;;  %3223 = vmatpush1.bf16.msra.mxu0 %v5587_v45  ;;  %v5647_v43 = vld [vmem:[%s7473_s3 + $0x8c8] ss:$16 sps:$4 sm:$0xff]   ;;  %v5652_v45 = vld [vmem:[%s7473_s3 + $0x8e4] ss:$16 sps:$4 sm:$0xff]  }
 0x1b0   :  { %3019 = vmatprep.subr.bf16.mxu1 %v5592_v46  ;;  %3224 = vmatprep.subr.bf16.mxu0 %v5595_v47  ;;  %v5655_v46 = vld [vmem:[%s7473_s3 + $0x8ec] ss:$16 sps:$4 sm:$0xff]   ;;  %v5650_v47 = vld [vmem:[%s7473_s3 + $0x8e0] ss:$16 sps:$4 sm:$0xff]  }
 0x1b3   :  { %3020 = vmatpush1.bf16.msra.mxu1 %v5590_v38  ;;  %3225 = vmatpush1.bf16.msra.mxu0 %v5593_v50  ;;  %v5653_v38 = vld [vmem:[%s7473_s3 + $0x8e8] ss:$16 sps:$4 sm:$0xff]   ;;  %v5658_v50 = vld [vmem:[%s7473_s3 + $0x904] ss:$16 sps:$4 sm:$0xff]  }
 0x1b4   :  { %3021 = vmatprep.subr.bf16.mxu1 %v5598_v51  ;;  %3226 = vmatprep.subr.bf16.mxu0 %v5601_v52  ;;  %v5661_v51 = vld [vmem:[%s7473_s3 + $0x90c] ss:$16 sps:$4 sm:$0xff]   ;;  %v5656_v52 = vld [vmem:[%s7473_s3 + $0x900] ss:$16 sps:$4 sm:$0xff]  }
 0x1b7   :  { %3022 = vmatpush1.bf16.msra.mxu1 %v5596_v56  ;;  %3227 = vmatpush1.bf16.msra.mxu0 %v5599_v57  ;;  %v5659_v56 = vld [vmem:[%s7473_s3 + $0x908] ss:$16 sps:$4 sm:$0xff]   ;;  %v5664_v57 = vld [vmem:[%s7473_s3 + $0x924] ss:$16 sps:$4 sm:$0xff]  }
 0x1b8   :  { %3023 = vmatprep.subr.bf16.mxu1 %v5604_v61  ;;  %3228 = vmatprep.subr.bf16.mxu0 %v5607_v62  ;;  %v5667_v61 = vld [vmem:[%s7473_s3 + $0x92c] ss:$16 sps:$4 sm:$0xff]   ;;  %v5662_v62 = vld [vmem:[%s7473_s3 + $0x920] ss:$16 sps:$4 sm:$0xff]  }
 0x1bb   :  { %3024 = vmatpush1.bf16.msra.mxu1 %v5602_v63  ;;  %3229 = vmatpush1.bf16.msra.mxu0 %v5605_v0  ;;  %v5665_v63 = vld [vmem:[%s7473_s3 + $0x928] ss:$16 sps:$4 sm:$0xff]   ;;  %v5670_v0 = vld [vmem:[%s7473_s3 + $0x944] ss:$16 sps:$4 sm:$0xff]  }
 0x1bc   :  { %3034 = vmatprep.subr.bf16.mxu1 %v5610_v4  ;;  %3239 = vmatprep.subr.bf16.mxu0 %v5613_v5  ;;  %v5668_v4 = vld [vmem:[%s7473_s3 + $0x940] ss:$16 sps:$4 sm:$0xff]   ;;  %v5671_v5 = vld [vmem:[%s7473_s3 + $0x948] ss:$16 sps:$4 sm:$0xff]  }
 0x1be   :  { %3026 = vmatmul.mubr.bf16.vlgmr.msra.gmra.mrb[20].mxu1 %v924_v13  ;;  %3231 = vmatmul.mubr.bf16.vlgmr.msra.gmra.mrb[24].mxu0 %v924_v13  ;;  %v5674_v13 = vld [vmem:[%s7473_s3 + $0x960] ss:$16 sps:$4 sm:$0xff]  }
 0x1bf   :  { %3035 = vmatpush1.bf16.msra.mxu1 %v5608_v12  ;;  %3066 = vmatprep.mubr.bf16.mxu1 %v927_v18  ;;  %v5679_v12 = vld [vmem:[%s7473_s3 + $0x96c] ss:$16 sps:$4 sm:$0xff]  }
 0x1c0   :  { %3240 = vmatpush1.bf16.msra.mxu0 %v5611_v32  ;;  %3271 = vmatprep.mubr.bf16.mxu0 %v927_v18  ;;  %v5677_v32 = vld [vmem:[%s7473_s3 + $0x968] ss:$16 sps:$4 sm:$0xff]   ;;  %v5682_v18 = vld [vmem:[%s7473_s3 + $0x984] ss:$16 sps:$4 sm:$0xff]  }
 0x1c1   :  { %3036 = vmatprep.subr.bf16.mxu1 %v5616_v55  ;;  %3241 = vmatprep.subr.bf16.mxu0 %v5619_v40  ;;  %v5685_v55 = vld [vmem:[%s7473_s3 + $0x98c] ss:$16 sps:$4 sm:$0xff]   ;;  %v5680_v40 = vld [vmem:[%s7473_s3 + $0x980] ss:$16 sps:$4 sm:$0xff]  }
 0x1c3   :  { %3037 = vmatpush1.bf16.msra.mxu1 %v5614_v19  ;;  %v5683_v19 = vld [vmem:[%s7473_s3 + $0x988] ss:$16 sps:$4 sm:$0xff]  }
 0x1c4   :  { %3242 = vmatpush1.bf16.msra.mxu0 %v5617_v20  ;;  %3038 = vmatprep.subr.bf16.mxu1 %v5622_v17  ;;  %v5688_v20 = vld [vmem:[%s7473_s3 + $0x9a4] ss:$16 sps:$4 sm:$0xff]   ;;  %v5691_v17 = vld [vmem:[%s7473_s3 + $0x9ac] ss:$16 sps:$4 sm:$0xff]  }
 0x1c5   :  { %3243 = vmatprep.subr.bf16.mxu0 %v5625_v21  ;;  %v5686_v21 = vld [vmem:[%s7473_s3 + $0x9a0] ss:$16 sps:$4 sm:$0xff]  }
 0x1c7   :  { %3039 = vmatpush1.bf16.msra.mxu1 %v5620_v22  ;;  %v5689_v22 = vld [vmem:[%s7473_s3 + $0x9a8] ss:$16 sps:$4 sm:$0xff]  }
 0x1c8   :  { %3244 = vmatpush1.bf16.msra.mxu0 %v5623_v23  ;;  %3040 = vmatprep.subr.bf16.mxu1 %v5628_v24  ;;  %v5694_v23 = vld [vmem:[%s7473_s3 + $0x9c4] ss:$16 sps:$4 sm:$0xff]   ;;  %v5697_v24 = vld [vmem:[%s7473_s3 + $0x9cc] ss:$16 sps:$4 sm:$0xff]  }
 0x1c9   :  { %3245 = vmatprep.subr.bf16.mxu0 %v5631_v36  ;;  %v5692_v36 = vld [vmem:[%s7473_s3 + $0x9c0] ss:$16 sps:$4 sm:$0xff]  }
 0x1cb   :  { %3041 = vmatpush1.bf16.msra.mxu1 %v5626_v26  ;;  %v5695_v26 = vld [vmem:[%s7473_s3 + $0x9c8] ss:$16 sps:$4 sm:$0xff]  }
 0x1cc   :  { %3246 = vmatpush1.bf16.msra.mxu0 %v5629_v28  ;;  %3042 = vmatprep.subr.bf16.mxu1 %v5634_v30  ;;  %v5700_v28 = vld [vmem:[%s7473_s3 + $0x9e4] ss:$16 sps:$4 sm:$0xff]   ;;  %v5703_v30 = vld [vmem:[%s7473_s3 + $0x9ec] ss:$16 sps:$4 sm:$0xff]  }
 0x1cd   :  { %3247 = vmatprep.subr.bf16.mxu0 %v5637_v31  ;;  %v5698_v31 = vld [vmem:[%s7473_s3 + $0x9e0] ss:$16 sps:$4 sm:$0xff]  }
 0x1cf   :  { %3043 = vmatpush1.bf16.msra.mxu1 %v5632_v60  ;;  %v884_v60 = vmax.f32 %v6388_v35, 0.0  ;;  %v5706_v35 = vld [vmem:[%s7475_s5] sm:$0xff]  }
 0x1d0   :  { %3248 = vmatpush1.bf16.msra.mxu0 %v5635_v10  ;;  %3044 = vmatprep.subr.bf16.mxu1 %v5640_v34  ;;  %v5701_v10 = vld [vmem:[%s7473_s3 + $0x9e8] ss:$16 sps:$4 sm:$0xff]   ;;  %v5704_v34 = vld [vmem:[%s7475_s5 + $0x40] sm:$0xff]  }
 0x1d1   :  { %3249 = vmatprep.subr.bf16.mxu0 %v5643_v37  ;;  %v5705_v37 = vld [vmem:[%s7475_s5 + $0xc0] sm:$0xff]  }
 0x1d3   :  { %3045 = vmatpush1.bf16.msra.mxu1 %v5638_v39  ;;  %v926_v39 = vpack.c.bf16 %v884_v60, %v884_v60 }
 0x1d4   :  { %3250 = vmatpush1.bf16.msra.mxu0 %v5641_v41  ;;  %3046 = vmatprep.subr.bf16.mxu1 %v5646_v33  ;;  %v5707_v41 = vld [vmem:[%s7475_s5 + $0x80] sm:$0xff]   ;;  %v5708_v33 = vld [vmem:[%s7475_s5 + $0x48] sm:$0xff]  }
 0x1d5   :  { %3251 = vmatprep.subr.bf16.mxu0 %v5649_v44  ;;  %v5709_v44 = vld [vmem:[%s7475_s5 + $0xc8] sm:$0xff]  }
 0x1d7   :  { %3047 = vmatpush1.bf16.msra.mxu1 %v5644_v42  ;;  %v5710_v42 = vld [vmem:[%s7475_s5 + $0x8] sm:$0xff]  }
 0x1d8   :  { %3252 = vmatpush1.bf16.msra.mxu0 %v5647_v43  ;;  %3048 = vmatprep.subr.bf16.mxu1 %v5652_v45  ;;  %v5711_v43 = vld [vmem:[%s7475_s5 + $0x88] sm:$0xff]   ;;  %v5712_v45 = vld [vmem:[%s7475_s5 + $0x50] sm:$0xff]  }
 0x1d9   :  { %3253 = vmatprep.subr.bf16.mxu0 %v5655_v46  ;;  %v5713_v46 = vld [vmem:[%s7475_s5 + $0xd0] sm:$0xff]  }
 0x1db   :  { %3049 = vmatpush1.bf16.msra.mxu1 %v5650_v47  ;;  %v5714_v47 = vld [vmem:[%s7475_s5 + $0x10] sm:$0xff]  }
 0x1dc   :  { %3254 = vmatpush1.bf16.msra.mxu0 %v5653_v38  ;;  %3050 = vmatprep.subr.bf16.mxu1 %v5658_v50  ;;  %v5715_v38 = vld [vmem:[%s7475_s5 + $0x90] sm:$0xff]   ;;  %v5716_v50 = vld [vmem:[%s7475_s5 + $0x58] sm:$0xff]  }
 0x1dd   :  { %3255 = vmatprep.subr.bf16.mxu0 %v5661_v51  ;;  %v5717_v51 = vld [vmem:[%s7475_s5 + $0xd8] sm:$0xff]  }
 0x1df   :  { %3051 = vmatpush1.bf16.msra.mxu1 %v5656_v52  ;;  %v5718_v52 = vld [vmem:[%s7475_s5 + $0x18] sm:$0xff]  }
 0x1e0   :  { %3256 = vmatpush1.bf16.msra.mxu0 %v5659_v56  ;;  %3052 = vmatprep.subr.bf16.mxu1 %v5664_v57  ;;  %v5719_v56 = vld [vmem:[%s7475_s5 + $0x98] sm:$0xff]   ;;  %v5720_v57 = vld [vmem:[%s7475_s5 + $0x60] sm:$0xff]  }
 0x1e1   :  { %3257 = vmatprep.subr.bf16.mxu0 %v5667_v61  ;;  %v5721_v61 = vld [vmem:[%s7475_s5 + $0xe0] sm:$0xff]  }
 0x1e3   :  { %3053 = vmatpush1.bf16.msra.mxu1 %v5662_v62  ;;  %v5722_v62 = vld [vmem:[%s7475_s5 + $0x20] sm:$0xff]  }
 0x1e4   :  { %3258 = vmatpush1.bf16.msra.mxu0 %v5665_v63  ;;  %3054 = vmatprep.subr.bf16.mxu1 %v5670_v0  ;;  %v5723_v63 = vld [vmem:[%s7475_s5 + $0xa0] sm:$0xff]   ;;  %v5724_v0 = vld [vmem:[%s7475_s5 + $0x68] sm:$0xff]  }
 0x1e5   :  { %3259 = vmatprep.subr.bf16.mxu0 %v5673_v2  ;;  %v5725_v2 = vld [vmem:[%s7475_s5 + $0xe8] sm:$0xff]  }
 0x1e7   :  { %3055 = vmatpush1.bf16.msra.mxu1 %v5668_v4  ;;  %v5726_v4 = vld [vmem:[%s7475_s5 + $0x28] sm:$0xff]  }
 0x1e8   :  { %3260 = vmatpush1.bf16.msra.mxu0 %v5671_v5  ;;  %3056 = vmatprep.subr.bf16.mxu1 %v5676_v7  ;;  %v5727_v5 = vld [vmem:[%s7475_s5 + $0xa8] sm:$0xff]   ;;  %v5728_v7 = vld [vmem:[%s7475_s5 + $0x70] sm:$0xff]  }
 0x1e9   :  { %3261 = vmatprep.subr.bf16.mxu0 %v5679_v12  ;;  %v5729_v12 = vld [vmem:[%s7475_s5 + $0xf0] sm:$0xff]  }
 0x1eb   :  { %3057 = vmatpush1.bf16.msra.mxu1 %v5674_v13  ;;  %v5730_v13 = vld [vmem:[%s7475_s5 + $0x30] sm:$0xff]  }
 0x1ec   :  { %3262 = vmatpush1.bf16.msra.mxu0 %v5677_v32  ;;  %3058 = vmatprep.subr.bf16.mxu1 %v5682_v18  ;;  %v5731_v32 = vld [vmem:[%s7475_s5 + $0xb0] sm:$0xff]   ;;  %v5732_v18 = vld [vmem:[%s7475_s5 + $0x78] sm:$0xff]  }
 0x1ed   :  { %3263 = vmatprep.subr.bf16.mxu0 %v5685_v55  ;;  %v5733_v55 = vld [vmem:[%s7475_s5 + $0xf8] sm:$0xff]  }
 0x1ef   :  { %3059 = vmatpush1.bf16.msra.mxu1 %v5680_v40  ;;  %v5734_v40 = vld [vmem:[%s7475_s5 + $0x38] sm:$0xff]  }
 0x1f0   :  { %3264 = vmatpush1.bf16.msra.mxu0 %v5683_v19  ;;  %3060 = vmatprep.subr.bf16.mxu1 %v5688_v20  ;;  %v5735_v19 = vld [vmem:[%s7475_s5 + $0xb8] sm:$0xff]   ;;  %v5736_v20 = vld [vmem:[%s7475_s5 + $0x140] sm:$0xff]  }
 0x1f1   :  { %3265 = vmatprep.subr.bf16.mxu0 %v5691_v17  ;;  %v5737_v17 = vld [vmem:[%s7475_s5 + $0x1c0] sm:$0xff]  }
 0x1f3   :  { %3061 = vmatpush1.bf16.msra.mxu1 %v5686_v21  ;;  %v5800_v21 = vld [vmem:[%s7472_s2] sm:$0xff] }
 0x1f4   :  { %3266 = vmatpush1.bf16.msra.mxu0 %v5689_v22  ;;  %3062 = vmatprep.subr.bf16.mxu1 %v5694_v23  ;;  %v82_v22 = vrot.slane %v5800_v21, %v6673_v8  ;;  %v86_v23 = vrot.slane %v5800_v21, %v6480_v27 }
 0x1f5   :  { %3267 = vmatprep.subr.bf16.mxu0 %v5697_v24  ;;  %v98_v24 = vrot.slane %v5800_v21, %v6264_v6 }
 0x1f6   :  { %v448_v60 = vadd.f32 %v6238_v48, %v82_v22 }
 0x1f7   :  { %3063 = vmatpush1.bf16.msra.mxu1 %v5692_v36  ;;  %v90_v36 = vrot.slane %v5800_v21, %v6354_v15 }
 0x1f8   :  { %3268 = vmatpush1.bf16.msra.mxu0 %v5695_v26  ;;  %3064 = vmatprep.subr.bf16.mxu1 %v5700_v28  ;;  %v94_v26 = vrot.slane %v5800_v21, %v6357_v16  ;;  %v1248_v28 = vld [vmem:[%s7474_s4] sm:$0xf] }
 0x1f9   :  { %3269 = vmatprep.subr.bf16.mxu0 %v5703_v30  ;;  %v5801_v30 = vld [vmem:[%s7472_s2 + $0x8] sm:$0xff]  ;;  %v1257_v48 = vrot.slane %v1248_v28, %v6480_v27 }
 0x1fa   :  { %v122_v6 = vrot.slane %v5801_v30, %v6354_v15 }
 0x1fb   :  { %3065 = vmatpush1.bf16.msra.mxu1 %v5698_v31  ;;  %v114_v31 = vrot.slane %v5801_v30, %v6673_v8 }
 0x1fc   :  { %3270 = vmatpush1.bf16.msra.mxu0 %v5701_v10  ;;  %4986 = vmatprep.subr.bf16.mxu1 %v5704_v34  ;;  %v450_v10 = vadd.f32 %v6240_v49, %v86_v23  ;;  %v530_v34 = vadd.f32 %v6242_v53, %v98_v24  ;;  %v5738_v23 = vld [vmem:[%s7475_s5 + $0x100] sm:$0xff]  }
 0x1fd   :  { %5008 = vmatprep.subr.bf16.mxu0 %v5705_v37  ;;  %v102_v37 = vrot.slane %v5800_v21, %v6267_v9  ;;  %v612_v49 = vadd.f32 %v6257_v1, %v114_v31  ;;  %v653_v9 = vadd.f32 %v6282_v25, %v122_v6  ;;  %v870_v25 = vmax.f32 %v6274_v11, 0.0  ;;  %v5741_v6 = vld [vmem:[%s7475_s5 + $0x1c8] sm:$0xff]  }
 0x1fe   :  { %3067 = vmatmul.mubr.bf16.vlgmr.msra.gmra.mrb[20].mxu1 %v926_v39  ;;  %v865_v53 = vmax.f32 %v450_v10, 0.0 }
 0x1ff   :  { %3272 = vmatmul.mubr.bf16.vlgmr.msra.gmra.mrb[24].mxu0 %v926_v39  ;;  %4987 = vmatpush3.bf16.msra.mxu1 %v5706_v35  ;;  %v489_v35 = vadd.f32 %v6248_v58, %v90_v36  ;;  %v1253_v39 = vrot.slane %v1248_v28, %v6673_v8  ;;  %v126_v58 = vrot.slane %v5801_v30, %v6357_v16  ;;  %v868_v8 = vmax.f32 %v530_v34, 0.0  ;;  %v5739_v36 = vld [vmem:[%s7475_s5 + $0x180] sm:$0xff]  }
 0x200   :  { %5009 = vmatpush3.bf16.msra.mxu0 %v5707_v41  ;;  %4988 = vmatprep.subr.bf16.mxu1 %v5708_v33  ;;  %v118_v41 = vrot.slane %v5801_v30, %v6480_v27  ;;  %v491_v33 = vadd.f32 %v6250_v59, %v94_v26 }
 0x201   :  { %5010 = vmatprep.subr.bf16.mxu0 %v5709_v44  ;;  %v1261_v44 = vrot.slane %v1248_v28, %v6354_v15 }
 0x202   :  { %v614_v27 = vadd.f32 %v6261_v3, %v118_v41  ;;  %v5745_v41 = vld [vmem:[%s7475_s5 + $0x1d0] sm:$0xff]  }
 0x203   :  { %4989 = vmatpush3.bf16.msra.mxu1 %v5710_v42  ;;  %v1265_v42 = vrot.slane %v1248_v28, %v6357_v16 }
 0x204   :  { %5011 = vmatpush3.bf16.msra.mxu0 %v5711_v43  ;;  %4990 = vmatprep.subr.bf16.mxu1 %v5712_v45  ;;  %v864_v43 = vmax.f32 %v448_v60, 0.0 }
 0x205   :  { %5012 = vmatprep.subr.bf16.mxu0 %v5713_v46  ;;  %v532_v46 = vadd.f32 %v6244_v54, %v102_v37  ;;  %v655_v54 = vadd.f32 %v6290_v29, %v126_v58  ;;  %v5742_v37 = vld [vmem:[%s7475_s5 + $0x108] sm:$0xff]   ;;  %v5754_v58 = vld [vmem:[%s7475_s5 + $0x120] sm:$0xff]  }
 0x207   :  { %4991 = vmatpush3.bf16.msra.mxu1 %v5714_v47  ;;  %v866_v47 = vmax.f32 %v489_v35, 0.0  ;;  %v5743_v35 = vld [vmem:[%s7475_s5 + $0x188] sm:$0xff]  }
 0x208   :  { %5013 = vmatpush3.bf16.msra.mxu0 %v5715_v38  ;;  %4992 = vmatprep.subr.bf16.mxu1 %v5716_v50  ;;  %v867_v50 = vmax.f32 %v491_v33, 0.0  ;;  %v5746_v33 = vld [vmem:[%s7475_s5 + $0x110] sm:$0xff]  }
 0x209   :  { %5014 = vmatprep.subr.bf16.mxu0 %v5717_v51 }
 0x20b   :  { %4993 = vmatpush3.bf16.msra.mxu1 %v5718_v52 }
 0x20c   :  { %5015 = vmatpush3.bf16.msra.mxu0 %v5719_v56  ;;  %4994 = vmatprep.subr.bf16.mxu1 %v5720_v57  ;;  %v872_v57 = vmax.f32 %v612_v49, 0.0  ;;  %v5749_v49 = vld [vmem:[%s7475_s5 + $0x1d8] sm:$0xff]  }
 0x20d   :  { %5016 = vmatprep.subr.bf16.mxu0 %v5721_v61 }
 0x20f   :  { %4995 = vmatpush3.bf16.msra.mxu1 %v5722_v62 }
 0x210   :  { %5017 = vmatpush3.bf16.msra.mxu0 %v5723_v63  ;;  %4996 = vmatprep.subr.bf16.mxu1 %v5724_v0  ;;  %v874_v0 = vmax.f32 %v653_v9, 0.0  ;;  %v5753_v9 = vld [vmem:[%s7475_s5 + $0x1e0] sm:$0xff]  }
 0x211   :  { %5018 = vmatprep.subr.bf16.mxu0 %v5725_v2 }
 0x213   :  { %4997 = vmatpush3.bf16.msra.mxu1 %v5726_v4 }
 0x214   :  { %5019 = vmatpush3.bf16.msra.mxu0 %v5727_v5  ;;  %4998 = vmatprep.subr.bf16.mxu1 %v5728_v7 }
 0x215   :  { %5020 = vmatprep.subr.bf16.mxu0 %v5729_v12 }
 0x217   :  { %4999 = vmatpush3.bf16.msra.mxu1 %v5730_v13 }
 0x218   :  { %5021 = vmatpush3.bf16.msra.mxu0 %v5731_v32  ;;  %5000 = vmatprep.subr.bf16.mxu1 %v5732_v18 }
 0x219   :  { %5022 = vmatprep.subr.bf16.mxu0 %v5733_v55 }
 0x21b   :  { %5001 = vmatpush3.bf16.msra.mxu1 %v5734_v40  ;;  %v869_v40 = vmax.f32 %v532_v46, 0.0  ;;  %v5757_v46 = vld [vmem:[%s7475_s5 + $0x1e8] sm:$0xff]  }
 0x21c   :  { %5023 = vmatpush3.bf16.msra.mxu0 %v5735_v19  ;;  %5030 = vmatprep.subr.bf16.mxu1 %v5736_v20  ;;  %v873_v19 = vmax.f32 %v614_v27, 0.0  ;;  %v871_v20 = vmax.f32 %v6278_v14, 0.0  ;;  %v5740_v14 = vld [vmem:[%s7475_s5 + $0x148] sm:$0xff]   ;;  %v5762_v27 = vld [vmem:[%s7475_s5 + $0x130] sm:$0xff]  }
 0x21d   :  { %5052 = vmatprep.subr.bf16.mxu0 %v5737_v17  ;;  %v875_v17 = vmax.f32 %v655_v54, 0.0 }
 0x2d1   :  { %v3068_v45 = vpop.f32.mrb[20].mxu1 }
 0x2d2   :  { %v5118_v59 = vadd.f32 %v3068_v45, %v1253_v39  ;;  %v3273_v38 = vpop.f32.mrb[24].mxu0  ;;  %v3070_v15 = vpop.f32.mrb[21].mxu1  ;;  %v5744_v39 = vld [vmem:[%s7475_s5 + $0x150] sm:$0xff]   ;;  %v5755_v45 = vld [vmem:[%s7475_s5 + $0x1a0] sm:$0xff]  }
 0x2d3   :  { %v5120_v1 = vadd.f32 %v3273_v38, %v1261_v44  ;;  %v5119_v51 = vadd.f32 %v3070_v15, %v1257_v48  ;;  %v3275_v52 = vpop.f32.mrb[25].mxu0  ;;  %v3072_v56 = vpop.f32.mrb[22].mxu1  ;;  %v5747_v44 = vld [vmem:[%s7475_s5 + $0x190] sm:$0xff]   ;;  %v5748_v48 = vld [vmem:[%s7475_s5 + $0x158] sm:$0xff]  }
 0x2d4   :  { %v3280_v61 = vmax.f32 %v5118_v59, 0.0  ;;  %v5121_v16 = vadd.f32 %v3275_v52, %v1265_v42  ;;  %v3277_v62 = vpop.f32.mrb[26].mxu0  ;;  %v3073_v63 = vpop.f32.mrb[23].mxu1  ;;  %v5750_v42 = vld [vmem:[%s7475_s5 + $0x118] sm:$0xff]   ;;  %v5759_v59 = vld [vmem:[%s7475_s5 + $0x1a8] sm:$0xff]   ;;  %v5760_v38 = vld [vmem:[%s7475_s5 + $0x170] sm:$0xff]  }
 0x2d5   :  { %v3282_v2 = vmax.f32 %v5120_v1, 0.0  ;;  %v3281_v4 = vmax.f32 %v5119_v51, 0.0  ;;  %v3278_v5 = vpop.f32.mrb[27].mxu0  ;;  %v5761_v15 = vld [vmem:[%s7475_s5 + $0x1f0] sm:$0xff]   ;;  %v5764_v1 = vld [vmem:[%s7475_s5 + $0x178] sm:$0xff]   ;;  %v5771_v62 = vld [vmem:[%s7475_s5 + $0x280] sm:$0xff]  }
 0x2d6   :  { %v3296_v7 = vadd.f32 %v3280_v61, %v864_v43  ;;  %v7238_v3 = vadd.f32 %v3280_v61, %v868_v8  ;;  %v7240_v12 = vadd.f32 %v3280_v61, %v872_v57  ;;  %v3283_v13 = vmax.f32 %v5121_v16, 0.0  ;;  %v5751_v43 = vld [vmem:[%s7475_s5 + $0x198] sm:$0xff]   ;;  %v5756_v8 = vld [vmem:[%s7475_s5 + $0x168] sm:$0xff]   ;;  %v5768_v57 = vld [vmem:[%s7475_s5 + $0x240] sm:$0xff]  }
 0x2d7   :  { %v3298_v32 = vadd.f32 %v3282_v2, %v866_v47  ;;  %v7242_v18 = vadd.f32 %v3282_v2, %v870_v25  ;;  %v7244_v11 = vadd.f32 %v3282_v2, %v874_v0  ;;  %v3297_v55 = vadd.f32 %v3281_v4, %v865_v53  ;;  %v5752_v53 = vld [vmem:[%s7475_s5 + $0x160] sm:$0xff]   ;;  %v5758_v47 = vld [vmem:[%s7475_s5 + $0x128] sm:$0xff]   ;;  %v5765_v51 = vld [vmem:[%s7475_s5 + $0x1f8] sm:$0xff]  }
 0x2d8   :  { %v3299_v29 = vadd.f32 %v3283_v13, %v867_v50  ;;  %v3300_v21 = vpack.c.bf16 %v3296_v7, %v3296_v7  ;;  %v3653_v26 = vadd.f32 %v3281_v4, %v869_v40  ;;  %v3655_v28 = vadd.f32 %v3283_v13, %v871_v20  ;;  %v5763_v50 = vld [vmem:[%s7475_s5 + $0x1b0] sm:$0xff]   ;;  %v5766_v52 = vld [vmem:[%s7475_s5 + $0x138] sm:$0xff]   ;;  %v5769_v25 = vld [vmem:[%s7475_s5 + $0x2c0] sm:$0xff]  }
 0x2d9   :  { %v3301_v22 = vpack.c.bf16 %v3297_v55, %v3297_v55  ;;  %v7253_v30 = vadd.f32 %v3281_v4, %v873_v19  ;;  %v3302_v31 = vpack.c.bf16 %v3298_v32, %v3298_v32  ;;  %v7258_v60 = vadd.f32 %v3283_v13, %v875_v17  ;;  %v5767_v56 = vld [vmem:[%s7475_s5 + $0x1b8] sm:$0xff]   ;;  %v5770_v61 = vld [vmem:[%s7475_s5 + $0x200] sm:$0xff]   ;;  %v5772_v0 = vld [vmem:[%s7475_s5 + $0x248] sm:$0xff]  }
 0x2da   :  { %v3303_v24 = vpack.c.bf16 %v3299_v29, %v3299_v29  ;;  %v3657_v10 = vpack.c.bf16 %v3653_v26, %v3653_v26  ;;  %v3659_v34 = vpack.c.bf16 %v3655_v28, %v3655_v28  ;;  %v3656_v16 = vpack.c.bf16 %v7238_v3, %v7238_v3  ;;  %v5773_v2 = vld [vmem:[%s7475_s5 + $0x2c8] sm:$0xff]   ;;  %v5776_v3 = vld [vmem:[%s7475_s5 + $0x250] sm:$0xff]   ;;  %v5780_v55 = vld [vmem:[%s7475_s5 + $0x258] sm:$0xff]  }
 0x2db   :  { %3599 = vmatprep.mubr.bf16.mxu1 %v3301_v22  ;;  %v3658_v63 = vpack.c.bf16 %v7242_v18, %v7242_v18  ;;  %v4016_v54 = vpack.c.bf16 %v7253_v30, %v7253_v30  ;;  %v4018_v4 = vpack.c.bf16 %v7258_v60, %v7258_v60  ;;  %v5774_v5 = vld [vmem:[%s7475_s5 + $0x208] sm:$0xff]   ;;  %v5777_v13 = vld [vmem:[%s7475_s5 + $0x2d0] sm:$0xff]   ;;  %v5781_v40 = vld [vmem:[%s7475_s5 + $0x2d8] sm:$0xff]  }
 0x2dc   :  { %3639 = vmatprep.mubr.bf16.mxu0 %v3303_v24  ;;  %3600 = vmatmul.mubr.bf16.vlgmr.msra.gmra.mrb[24].mxu1 %v3300_v21  ;;  %v5775_v7 = vld [vmem:[%s7475_s5 + $0x288] sm:$0xff]   ;;  %v5778_v32 = vld [vmem:[%s7475_s5 + $0x210] sm:$0xff]   ;;  %v5782_v19 = vld [vmem:[%s7475_s5 + $0x218] sm:$0xff]  }
 0x2dd   :  { %3640 = vmatmul.mubr.bf16.vlgmr.msra.gmra.mrb[28].mxu0 %v3302_v31  ;;  %5031 = vmatpush3.bf16.msra.mxu1 %v5738_v23  ;;  %v5779_v18 = vld [vmem:[%s7475_s5 + $0x290] sm:$0xff]   ;;  %v5783_v20 = vld [vmem:[%s7475_s5 + $0x298] sm:$0xff]   ;;  %v5784_v29 = vld [vmem:[%s7475_s5 + $0x260] sm:$0xff]  }
 0x2de   :  { %5053 = vmatpush3.bf16.msra.mxu0 %v5739_v36  ;;  %3957 = vmatprep.mubr.bf16.mxu1 %v3657_v10  ;;  %v5785_v17 = vld [vmem:[%s7475_s5 + $0x2e0] sm:$0xff]   ;;  %v5788_v23 = vld [vmem:[%s7475_s5 + $0x268] sm:$0xff]   ;;  %v5792_v28 = vld [vmem:[%s7475_s5 + $0x270] sm:$0xff]  }
 0x2df   :  { %3997 = vmatprep.mubr.bf16.mxu0 %v3659_v34  ;;  %5032 = vmatprep.subr.bf16.mxu1 %v5740_v14  ;;  %v5786_v21 = vld [vmem:[%s7475_s5 + $0x220] sm:$0xff]   ;;  %v5789_v24 = vld [vmem:[%s7475_s5 + $0x2e8] sm:$0xff]   ;;  %v5793_v30 = vld [vmem:[%s7475_s5 + $0x2f0] sm:$0xff]  }
 0x2e0   :  { %5054 = vmatprep.subr.bf16.mxu0 %v5741_v6  ;;  %v5787_v22 = vld [vmem:[%s7475_s5 + $0x2a0] sm:$0xff]   ;;  %v5790_v36 = vld [vmem:[%s7475_s5 + $0x228] sm:$0xff]   ;;  %v5794_v31 = vld [vmem:[%s7475_s5 + $0x230] sm:$0xff]  }
 0x2e1   :  { %5033 = vmatpush3.bf16.msra.mxu1 %v5742_v37  ;;  %v5791_v26 = vld [vmem:[%s7475_s5 + $0x2a8] sm:$0xff]   ;;  %v5795_v14 = vld [vmem:[%s7475_s5 + $0x2b0] sm:$0xff]   ;;  %v5796_v60 = vld [vmem:[%s7475_s5 + $0x278] sm:$0xff]   ;;  %v4015_v37 = vpack.c.bf16 %v7240_v12, %v7240_v12 }
 0x2e2   :  { %5055 = vmatpush3.bf16.msra.mxu0 %v5743_v35  ;;  %5034 = vmatprep.subr.bf16.mxu1 %v5744_v39  ;;  %v5797_v10 = vld [vmem:[%s7475_s5 + $0x2f8] sm:$0xff]   ;;  %v4017_v35 = vpack.c.bf16 %v7244_v11, %v7244_v11 }
 0x2e3   :  { %5056 = vmatprep.subr.bf16.mxu0 %v5745_v41  ;;  %v5798_v6 = vld [vmem:[%s7475_s5 + $0x238] sm:$0xff]  }
 0x2e4   :  { %v5799_v34 = vld [vmem:[%s7475_s5 + $0x2b8] sm:$0xff]  }
 0x2e5   :  { %5035 = vmatpush3.bf16.msra.mxu1 %v5746_v33  ;;  %v4757_v33 = vld [vmem:[%s7476_s6] ss:$0 sm:$0xff] }
 0x2e6   :  { %5057 = vmatpush3.bf16.msra.mxu0 %v5747_v44  ;;  %5036 = vmatprep.subr.bf16.mxu1 %v5748_v48 }
 0x2e7   :  { %5058 = vmatprep.subr.bf16.mxu0 %v5749_v49 }
 0x2e9   :  { %5037 = vmatpush3.bf16.msra.mxu1 %v5750_v42 }
 0x2ea   :  { %5059 = vmatpush3.bf16.msra.mxu0 %v5751_v43  ;;  %5038 = vmatprep.subr.bf16.mxu1 %v5752_v53 }
 0x2eb   :  { %5060 = vmatprep.subr.bf16.mxu0 %v5753_v9 }
 0x2ed   :  { %5039 = vmatpush3.bf16.msra.mxu1 %v5754_v58 }
 0x2ee   :  { %5061 = vmatpush3.bf16.msra.mxu0 %v5755_v45  ;;  %5040 = vmatprep.subr.bf16.mxu1 %v5756_v8 }
 0x2ef   :  { %5062 = vmatprep.subr.bf16.mxu0 %v5757_v46  ;;  %v4855_v46 = vld [vmem:[%s7476_s6 + $0x1] ss:$0 sm:$0xff] }
 0x2f1   :  { %5041 = vmatpush3.bf16.msra.mxu1 %v5758_v47 }
 0x2f2   :  { %5063 = vmatpush3.bf16.msra.mxu0 %v5759_v59  ;;  %5042 = vmatprep.subr.bf16.mxu1 %v5760_v38 }
 0x2f3   :  { %5064 = vmatprep.subr.bf16.mxu0 %v5761_v15 }
 0x2f5   :  { %5043 = vmatpush3.bf16.msra.mxu1 %v5762_v27 }
 0x2f6   :  { %5065 = vmatpush3.bf16.msra.mxu0 %v5763_v50  ;;  %5044 = vmatprep.subr.bf16.mxu1 %v5764_v1 }
 0x2f7   :  { %5066 = vmatprep.subr.bf16.mxu0 %v5765_v51 }
 0x2f9   :  { %5045 = vmatpush3.bf16.msra.mxu1 %v5766_v52 }
 0x2fa   :  { %5067 = vmatpush3.bf16.msra.mxu0 %v5767_v56  ;;  %5074 = vmatprep.subr.bf16.mxu1 %v5768_v57 }
 0x2fb   :  { %5096 = vmatprep.subr.bf16.mxu0 %v5769_v25 }
 0x2fc   :  { %3958 = vmatmul.mubr.bf16.vlgmr.msra.gmra.mrb[28].mxu1 %v3656_v16 }
 0x2fd   :  { %3998 = vmatmul.mubr.bf16.vlgmr.msra.gmra.mrb[32].mxu0 %v3658_v63  ;;  %5075 = vmatpush3.bf16.msra.mxu1 %v5770_v61  ;;  %v4953_v61 = vld [vmem:[%s7476_s6 + $0x2] ss:$0 sm:$0xff] }
 0x2fe   :  { %4316 = vmatprep.mubr.bf16.mxu1 %v4016_v54  ;;  %5097 = vmatpush3.bf16.msra.mxu0 %v5771_v62 }
 0x2ff   :  { %4356 = vmatprep.mubr.bf16.mxu0 %v4018_v4  ;;  %5076 = vmatprep.subr.bf16.mxu1 %v5772_v0 }
 0x300   :  { %5098 = vmatprep.subr.bf16.mxu0 %v5773_v2 }
 0x301   :  { %5077 = vmatpush3.bf16.msra.mxu1 %v5774_v5 }
 0x302   :  { %5099 = vmatpush3.bf16.msra.mxu0 %v5775_v7  ;;  %5078 = vmatprep.subr.bf16.mxu1 %v5776_v3 }
 0x303   :  { %5100 = vmatprep.subr.bf16.mxu0 %v5777_v13 }
 0x305   :  { %5079 = vmatpush3.bf16.msra.mxu1 %v5778_v32 }
 0x306   :  { %5101 = vmatpush3.bf16.msra.mxu0 %v5779_v18  ;;  %5080 = vmatprep.subr.bf16.mxu1 %v5780_v55 }
 0x307   :  { %5102 = vmatprep.subr.bf16.mxu0 %v5781_v40 }
 0x309   :  { %5081 = vmatpush3.bf16.msra.mxu1 %v5782_v19 }
 0x30a   :  { %5103 = vmatpush3.bf16.msra.mxu0 %v5783_v20  ;;  %5082 = vmatprep.subr.bf16.mxu1 %v5784_v29 }
 0x30b   :  { %5104 = vmatprep.subr.bf16.mxu0 %v5785_v17 }
 0x30d   :  { %5083 = vmatpush3.bf16.msra.mxu1 %v5786_v21 }
 0x30e   :  { %5105 = vmatpush3.bf16.msra.mxu0 %v5787_v22  ;;  %5084 = vmatprep.subr.bf16.mxu1 %v5788_v23 }
 0x30f   :  { %5106 = vmatprep.subr.bf16.mxu0 %v5789_v24 }
 0x311   :  { %5085 = vmatpush3.bf16.msra.mxu1 %v5790_v36 }
 0x312   :  { %5107 = vmatpush3.bf16.msra.mxu0 %v5791_v26  ;;  %5086 = vmatprep.subr.bf16.mxu1 %v5792_v28 }
 0x313   :  { %5108 = vmatprep.subr.bf16.mxu0 %v5793_v30 }
 0x315   :  { %5087 = vmatpush3.bf16.msra.mxu1 %v5794_v31 }
 0x316   :  { %5109 = vmatpush3.bf16.msra.mxu0 %v5795_v14  ;;  %5088 = vmatprep.subr.bf16.mxu1 %v5796_v60 }
 0x317   :  { %5110 = vmatprep.subr.bf16.mxu0 %v5797_v10 }
 0x319   :  { %5089 = vmatpush3.bf16.msra.mxu1 %v5798_v6 }
 0x31a   :  { %5111 = vmatpush3.bf16.msra.mxu0 %v5799_v34 }
 0x31c   :  { %4317 = vmatmul.mubr.bf16.vlgmr.msra.gmra.mrb[32].mxu1 %v4015_v37 }
 0x31d   :  { %4357 = vmatmul.mubr.bf16.vlgmr.msra.gmra.mrb[36].mxu0 %v4017_v35 }
 0x3af   :  { %v5002_v39 = vpop.f32.mrb[24].mxu1 }
 0x3b0   :  { %v5024_v41 = vpop.f32.mrb[28].mxu0  ;;  %v5003_v44 = vpop.f32.mrb[25].mxu1 }
 0x3b1   :  { %v5004_v48 = vadd.f32 %v5003_v44, %v5002_v39  ;;  %v5025_v49 = vpop.f32.mrb[29].mxu0  ;;  %v5005_v42 = vpop.f32.mrb[26].mxu1 }
 0x3b2   :  { %v5026_v43 = vadd.f32 %v5025_v49, %v5024_v41  ;;  %v5027_v53 = vpop.f32.mrb[30].mxu0  ;;  %v5006_v9 = vpop.f32.mrb[27].mxu1 }
 0x3b3   :  { %v3602_v12 = vadd.f32 %v5004_v48, %v4757_v33  ;;  %v5028_v58 = vpop.f32.mrb[31].mxu0 }
 0x3b5   :  { %v3642_v45 = vadd.f32 %v5026_v43, %v3602_v12 }
 0x3b7   :  { %3647 = vst [vmem:[#allocation4] sm:$0xff] %v3642_v45 }
 0x3cf   :  { %v5046_v11 = vpop.f32.mrb[28].mxu1 }
 0x3d0   :  { %v5068_v8 = vpop.f32.mrb[32].mxu0  ;;  %v5047_v47 = vpop.f32.mrb[29].mxu1 }
 0x3d1   :  { %v5048_v59 = vadd.f32 %v5047_v47, %v5046_v11  ;;  %v5069_v38 = vpop.f32.mrb[33].mxu0  ;;  %v5049_v15 = vpop.f32.mrb[30].mxu1 }
 0x3d2   :  { %v5070_v27 = vadd.f32 %v5069_v38, %v5068_v8  ;;  %v5071_v50 = vpop.f32.mrb[34].mxu0  ;;  %v5050_v1 = vpop.f32.mrb[31].mxu1 }
 0x3d3   :  { %v3960_v51 = vadd.f32 %v5048_v59, %v4855_v46  ;;  %v5072_v52 = vpop.f32.mrb[35].mxu0 }
 0x3d5   :  { %v4000_v56 = vadd.f32 %v5070_v27, %v3960_v51 }
 0x3d7   :  { %4006 = vst [vmem:[#allocation4 + $0x8] sm:$0xff] %v4000_v56 }
 0x3ef   :  { %v5090_v57 = vpop.f32.mrb[32].mxu1 }
 0x3f0   :  { %v5112_v25 = vpop.f32.mrb[36].mxu0  ;;  %v5091_v16 = vpop.f32.mrb[33].mxu1 }
 0x3f1   :  { %v5092_v62 = vadd.f32 %v5091_v16, %v5090_v57  ;;  %v5113_v63 = vpop.f32.mrb[37].mxu0  ;;  %v5093_v0 = vpop.f32.mrb[34].mxu1 }
 0x3f2   :  { %v5114_v54 = vadd.f32 %v5113_v63, %v5112_v25  ;;  %v5115_v2 = vpop.f32.mrb[38].mxu0  ;;  %v5094_v4 = vpop.f32.mrb[35].mxu1 }
 0x3f3   :  { %v4319_v5 = vadd.f32 %v5092_v62, %v4953_v61  ;;  %v5116_v7 = vpop.f32.mrb[39].mxu0 }
 0x3f5   :  { %v4359_v3 = vadd.f32 %v5114_v54, %v4319_v5 }
 0x3f7   :  { %4365 = vst [vmem:[#allocation4 + $0x10] sm:$0xff] %v4359_v3 }
 0x3f8   :  { %5813 = shalt.err (!%p5810_p4)
}
 0x3f9   :  { %s5814_s1 = scalar_lea.hbm %s7477_s7, 384 }
 0x3fa   :  { %p5815_p5 = scmp.ne.s32.totalorder %s7477_s7, %s5814_s1  ;;  %p5818_p6 = scmp.lt.u32.totalorder %s5814_s1, %s7477_s7 }
 0x3fc   :  { %p5820_p7 = pnand %p5818_p6, %p5815_p5 }
 0x3fe   :  { %5823 = shalt.err (!%p5820_p7)
}
 0x3ff   :  { %s5828_s9 = smov 128   ;;  %s5829_s10 = smov 8  }
 0x400   :  { %4377 = dma.vmem_to_hbm [thread:$0]  %s4372_s25, 384, %s7477_s7, [#allocation5], %s5828_s9, %s5828_s9, %s5829_s10  }
 0x401   :  { %5824 = dma.done.wait [#allocation5], 384  }
 0x402   :  { %5825 = vsyncadd [#allocation5], 4294966912 }
 0x403   :  { %4381 = vsyncpa [#allocation5], 1 }

</bundles_post_ra>
